<compile_context>
chip_gen: v5e
topology: v5e:2x2
jax: 0.10.0
libtpu: 0.0.40
codegen_flags: <defaults>
</compile_context>

<pallas_src>
import functools

import jax
import jax.numpy as jnp
from jax import lax
from jax.experimental import pallas as pl
from jax.experimental.pallas import tpu as pltpu

# ----- model hyper-parameters (small, consistent with the module) -----------
VOCAB_SIZE = 100
EMB_DIM = 32
N_FILTERS = 8
FILTER_SIZES = (2, 3, 4)
OUT_DIM = 2            # fc output is hard-coded to 2 in the module
SEQ_LEN = 16
BATCH = 16
TILE_B = 16            # whole batch in one tile -> grid=(1,) (best v5e/v6e);
                       # set 8 to split across both v7x TensorCores.
LANE = 128             # lane-dense slab width (per-shift block & output)


# ----------------------------- Pallas kernel --------------------------------
def _cnn_kernel(branch_ref,                     # SMEM scalar prefetch (unused in body)
                tok_ref,                        # [TILE_B*S, 1] int32 token ids
                tproj_ref,                      # [V, max_fs*128] embedding @ W_all
                bconv_ref,                      # [1, 128] conv biases (zero padded)
                weff_ref,                       # [128, 128] selected effective fc weight
                beff_ref,                       # [1, 128] selected effective fc bias
                out_ref,                        # [TILE_B, 128]
                *, seq_len, n_filters, filter_sizes):
    del branch_ref  # branch selection is done by the weff/beff index_map
    S = seq_len
    F = n_filters
    max_fs = max(filter_sizes)
    BtS = tok_ref.shape[0]
    Bt = BtS // S
    vocab = tproj_ref.shape[0]
    lane = bconv_ref.shape[-1]

    # --- fused embedding gather + every conv tap: ONE MXU matmul -------------
    ids = tok_ref[...]                                          # [BtS, 1] int32
    onehot = (lax.broadcasted_iota(jnp.int32, (BtS, vocab), 1)
              == ids).astype(jnp.float32)
    y2d = jnp.dot(onehot, tproj_ref[...],
                  preferred_element_type=jnp.float32)           # [BtS, max_fs*128]

    # --- shifted sums via XLU sublane rolls on lane-aligned 128-wide slabs ---
    # Values rolled in from the next batch row (or wrapped around the slab)
    # land only at positions with s + fs > S, which are zero-masked below.
    conv = y2d[:, 0:lane]
    for k in range(1, max_fs):                                  # static unroll
        conv = conv + pltpu.roll(y2d[:, k * lane:(k + 1) * lane],
                                 shift=BtS - k, axis=0)
    conv = jnp.maximum(conv + bconv_ref[...], 0.0)              # bias + ReLU

    # --- zero-mask invalid tail positions (exact: conv >= 0 post-ReLU) -------
    t_idx = lax.broadcasted_iota(jnp.int32, (S, lane), 0)
    col = lax.broadcasted_iota(jnp.int32, (S, lane), 1)
    fs_col = jnp.where(col < F, filter_sizes[0],
                       jnp.where(col < 2 * F, filter_sizes[1], filter_sizes[2]))
    valid = ((t_idx + fs_col) <= S).astype(jnp.float32)         # [S, 128]

    # --- global max-pool over the sequence: reshape + sublane reduce ---------
    conv3 = conv.reshape(Bt, S, lane) * valid[None, :, :]
    pooled = jnp.max(conv3, axis=1)                             # [Bt, 128]

    # --- single effective fc (fc1/fc2/fc3 + fc pre-folded per branch) --------
    out_ref[...] = jnp.dot(pooled, weff_ref[...],
                           preferred_element_type=jnp.float32) + beff_ref[...]


# ------------------------------ wrapper --------------------------------------
def pack_params(params, filter_sizes=FILTER_SIZES):
    """One-time repacking of module parameters into the fused kernel layout."""
    E = params["embedding"].shape[1]
    F = params["b0"].shape[-1]
    TF = len(filter_sizes) * F                  # 24
    max_fs = max(filter_sizes)                  # 4

    # Shift block k lives in its own 128-lane slab; filter i occupies lanes
    # [i*F, (i+1)*F) of that slab (zeros elsewhere, incl. shifts >= fs_i).
    w_all = jnp.zeros((E, max_fs * LANE), jnp.float32)
    for i, fs in enumerate(filter_sizes):
        w_i = params[f"w{i}"]                                   # [fs, E, F]
        for k in range(fs):
            c0 = k * LANE + i * F
            w_all = w_all.at[:, c0:c0 + F].set(w_i[k])
    table_proj = params["embedding"].astype(jnp.float32) @ w_all  # [V, 4*128]

    b_conv = jnp.zeros((1, LANE), jnp.float32).at[0, :TF].set(
        jnp.concatenate([params["b0"], params["b1"], params["b2"]], axis=-1))

    # Fold fc1/fc2/fc3 + fc into one effective weight/bias per branch.
    # out = (cat@w1+b1)@Wa + (cat@w_sel+b_sel)@Wb + b_other@Wc + fc_b
    fc_w, fc_b = params["fc_w"], params["fc_b"]                 # [3TF,2], [2]
    Wa, Wb, Wc = fc_w[:TF], fc_w[TF:2 * TF], fc_w[2 * TF:]
    w1, w2, w3 = params["fc1_w"], params["fc2_w"], params["fc3_w"]
    b1, b2, b3 = params["fc1_b"], params["fc2_b"], params["fc3_b"]

    w_eff0 = w1 @ Wa + w2 @ Wb                                  # sum(y) == 0
    w_eff1 = w1 @ Wa + w3 @ Wb                                  # sum(y) != 0
    b_eff0 = b1 @ Wa + b2 @ Wb + b3 @ Wc + fc_b
    b_eff1 = b1 @ Wa + b3 @ Wb + b2 @ Wc + fc_b

    w_eff = jnp.zeros((2, LANE, LANE), jnp.float32)
    w_eff = w_eff.at[0, :TF, :OUT_DIM].set(w_eff0)
    w_eff = w_eff.at[1, :TF, :OUT_DIM].set(w_eff1)
    b_eff = jnp.zeros((2, 1, LANE), jnp.float32)
    b_eff = b_eff.at[0, 0, :OUT_DIM].set(b_eff0)
    b_eff = b_eff.at[1, 0, :OUT_DIM].set(b_eff1)

    return {"table_proj": table_proj, "b_conv": b_conv,
            "w_eff": w_eff, "b_eff": b_eff}


def cnn_forward(x_tokens, y, packed, *, seq_len=SEQ_LEN, tile_b=TILE_B,
                filter_sizes=FILTER_SIZES, n_filters=N_FILTERS):
    """x_tokens: int32 [seq_len, batch]; y: domain labels (any shape)."""
    S, B = x_tokens.shape
    assert S == seq_len
    max_fs = max(filter_sizes)
    V = packed["table_proj"].shape[0]

    n_tiles = pl.cdiv(B, tile_b)
    B_pad = n_tiles * tile_b
    tok = x_tokens.T.astype(jnp.int32)                          # [B, S]
    if B_pad != B:
        tok = jnp.concatenate(
            [tok, jnp.zeros((B_pad - B, S), jnp.int32)], axis=0)
    tok_flat = tok.reshape(B_pad * S, 1)                        # row = b*S + s

    # Branch index computed outside the kernel; consumed only by index_maps.
    branch = (jnp.sum(y) != 0).astype(jnp.int32).reshape(1)     # 0: sum==0, 1: else

    kernel = functools.partial(_cnn_kernel, seq_len=seq_len,
                               n_filters=n_filters, filter_sizes=filter_sizes)

    def branch_map(i, br):          # data-dependent slab pick via scalar prefetch
        return (br[0], 0, 0)

    grid_spec = pltpu.PrefetchScalarGridSpec(
        num_scalar_prefetch=1,
        grid=(n_tiles,),
        in_specs=[
            pl.BlockSpec((tile_b * S, 1), lambda i, br: (i, 0)),          # tokens
            pl.BlockSpec((V, max_fs * LANE), lambda i, br: (0, 0)),       # table_proj
            pl.BlockSpec((1, LANE), lambda i, br: (0, 0)),                # b_conv
            pl.BlockSpec((None, LANE, LANE), branch_map),                 # w_eff[br]
            pl.BlockSpec((None, 1, LANE), branch_map),                    # b_eff[br]
        ],
        out_specs=pl.BlockSpec((tile_b, LANE), lambda i, br: (i, 0)),
    )

    out = pl.pallas_call(
        kernel,
        out_shape=jax.ShapeDtypeStruct((B_pad, LANE), jnp.float32),
        grid_spec=grid_spec,
        compiler_params=pltpu.CompilerParams(
            dimension_semantics=("arbitrary",)),
    )(branch, tok_flat, packed["table_proj"], packed["b_conv"],
      packed["w_eff"], packed["b_eff"])

    return out[:B, :OUT_DIM]


# --------------------------- pure-JAX reference -------------------------------
def cnn_reference(x_tokens, y, params, filter_sizes=FILTER_SIZES):
    x = x_tokens.T
    emb = jnp.take(params["embedding"], x, axis=0).astype(jnp.float32)  # [B,S,E]
    B, S, _ = emb.shape
    pooled = []
    for i, fs in enumerate(filter_sizes):
        w = params[f"w{i}"]                                     # [fs, E, F]
        b = params[f"b{i}"]                                     # [F]
        L = S - fs + 1
        acc = jnp.zeros((B, L, w.shape[-1]), jnp.float32)
        for k in range(fs):
            acc = acc + jnp.einsum("ble,ef->blf", emb[:, k:k + L, :], w[k])
        conv = jax.nn.relu(acc + b[None, None, :])
        pooled.append(jnp.max(conv, axis=1))
    cat = jnp.concatenate(pooled, axis=-1)        # dropout = eval-mode identity

    datax = cat @ params["fc1_w"] + params["fc1_b"]
    fc2_cat = cat @ params["fc2_w"] + params["fc2_b"]
    fc3_cat = cat @ params["fc3_w"] + params["fc3_b"]
    fc2_zero = jnp.broadcast_to(params["fc2_b"], cat.shape)
    fc3_zero = jnp.broadcast_to(params["fc3_b"], cat.shape)
    cond = jnp.sum(y) == 0
    datay = jnp.where(cond, fc2_cat, fc3_cat)
    dataz = jnp.where(cond, fc3_zero, fc2_zero)
    big = jnp.concatenate([datax, datay, dataz], axis=-1)       # [B, 9F]
    return big @ params["fc_w"] + params["fc_b"]


# --------------------------- parameter construction ---------------------------
def make_params(key, vocab=VOCAB_SIZE, emb_dim=EMB_DIM, n_filters=N_FILTERS,
                filter_sizes=FILTER_SIZES, out_dim=OUT_DIM):
    TF = len(filter_sizes) * n_filters
    ks = iter(jax.random.split(key, 16))
    p = {"embedding": jax.random.normal(next(ks), (vocab, emb_dim), jnp.float32)}
    # conv_i weights stored as [fs, E, F]  (== PyTorch [F, 1, fs, E] transposed)
    for i, fs in enumerate(filter_sizes):
        p[f"w{i}"] = 0.1 * jax.random.normal(next(ks), (fs, emb_dim, n_filters),
                                             jnp.float32)
        p[f"b{i}"] = 0.1 * jax.random.normal(next(ks), (n_filters,), jnp.float32)
    # fc1/fc2/fc3: Linear(3F, 3F), stored input-major ([in, out] == torch W.T)
    for name in ("fc1", "fc2", "fc3"):
        p[f"{name}_w"] = 0.1 * jax.random.normal(next(ks), (TF, TF), jnp.float32)
        p[f"{name}_b"] = 0.1 * jax.random.normal(next(ks), (TF,), jnp.float32)
    # fc: Linear(9F, 2)
    p["fc_w"] = 0.1 * jax.random.normal(next(ks), (3 * TF, out_dim), jnp.float32)
    p["fc_b"] = 0.1 * jax.random.normal(next(ks), (out_dim,), jnp.float32)
    return p


if __name__ == "__main__":
    key = jax.random.PRNGKey(0)
    k_params, k_tokens, k_y = jax.random.split(key, 3)
    params = make_params(k_params)
    packed = pack_params(params)

    # token ids, shape [seq_len, batch] like the PyTorch module expects
    x_tokens = jax.random.randint(k_tokens, (SEQ_LEN, BATCH), 0, VOCAB_SIZE,
                                  jnp.int32)
    y_nonzero = jax.random.randint(k_y, (BATCH,), 1, 3, jnp.int32)  # sum != 0
    y_zero = jnp.zeros((BATCH,), jnp.int32)                         # sum == 0

    for y in (y_nonzero, y_zero):                                   # both branches
        out = jax.block_until_ready(cnn_forward(x_tokens, y, packed))
        ref = cnn_reference(x_tokens, y, params)
        assert out.shape == (BATCH, OUT_DIM)
        assert jnp.allclose(out, ref, atol=1e-3, rtol=1e-3), (out, ref)

    print("KERNEL_OK")
</pallas_src>

<mosaic_0001>
module attributes {stable_mosaic.version = 11 : i64} {
  func.func @_cnn_kernel(%arg0: i32, %arg1: memref<1xi32, #tpu.memory_space<smem>>, %arg2: memref<256x1xi32, #tpu.memory_space<vmem>>, %arg3: memref<100x512xf32, #tpu.memory_space<vmem>>, %arg4: memref<1x128xf32, #tpu.memory_space<vmem>>, %arg5: memref<1x128x128xf32, #tpu.memory_space<vmem>>, %arg6: memref<1x1x128xf32, #tpu.memory_space<vmem>>, %arg7: memref<16x128xf32, #tpu.memory_space<vmem>>) attributes {dimension_semantics = [#tpu.dimension_semantics<arbitrary>], iteration_bounds = array<i64: 1>, scalar_prefetch = 1 : i64, scratch_operands = 0 : i64, tpu.core_type = #tpu.core_type<tc>, window_params = [{transform_indices = @transform_0, window_bounds = array<i64: 256, 1>}, {pipeline_mode = #tpu.pipeline_mode<synchronous>, transform_indices = @transform_1, window_bounds = array<i64: 100, 512>}, {pipeline_mode = #tpu.pipeline_mode<synchronous>, transform_indices = @transform_2, window_bounds = array<i64: 1, 128>}, {transform_indices = @transform_3, window_bounds = array<i64: 1, 128, 128>}, {transform_indices = @transform_4, window_bounds = array<i64: 1, 1, 128>}, {transform_indices = @transform_5, window_bounds = array<i64: 16, 128>}]} {
    %c0 = arith.constant 0 : index
    %c0_0 = arith.constant 0 : index
    %0 = vector.load %arg2[%c0, %c0_0] : memref<256x1xi32, #tpu.memory_space<vmem>>, vector<256x1xi32>
    %1 = tpu.iota {dimensions = array<i32: 1>} : vector<256x100xi32>
    %2 = vector.broadcast %0 : vector<256x1xi32> to vector<256x100xi32>
    %3 = arith.cmpi eq, %1, %2 : vector<256x100xi32>
    %4 = arith.extui %3 : vector<256x100xi1> to vector<256x100xi32>
    %5 = arith.sitofp %4 : vector<256x100xi32> to vector<256x100xf32>
    %c0_1 = arith.constant 0 : index
    %c0_2 = arith.constant 0 : index
    %6 = vector.load %arg3[%c0_1, %c0_2] : memref<100x512xf32, #tpu.memory_space<vmem>>, vector<100x512xf32>
    %cst = arith.constant dense<0.000000e+00> : vector<256x512xf32>
    %7 = tpu.matmul %5, %6, %cst {dimension_numbers = #tpu.dot_dimension_numbers<[1], [0], [0], [1], [0, 0, 1, 1], [], []>} : vector<256x100xf32>, vector<100x512xf32>, vector<256x512xf32> -> vector<256x512xf32>
    %8 = vector.extract_strided_slice %7 {offsets = [0, 0], sizes = [256, 128], strides = [1, 1]} : vector<256x512xf32> to vector<256x128xf32>
    %9 = vector.extract_strided_slice %7 {offsets = [0, 128], sizes = [256, 128], strides = [1, 1]} : vector<256x512xf32> to vector<256x128xf32>
    %c255_i32 = arith.constant 255 : i32
    %10 = tpu.dynamic_rotate %9 by %c255_i32 dim 0 : vector<256x128xf32>, i32 -> vector<256x128xf32>
    %11 = arith.addf %8, %10 : vector<256x128xf32>
    %12 = vector.extract_strided_slice %7 {offsets = [0, 256], sizes = [256, 128], strides = [1, 1]} : vector<256x512xf32> to vector<256x128xf32>
    %c254_i32 = arith.constant 254 : i32
    %13 = tpu.dynamic_rotate %12 by %c254_i32 dim 0 : vector<256x128xf32>, i32 -> vector<256x128xf32>
    %14 = arith.addf %11, %13 : vector<256x128xf32>
    %15 = vector.extract_strided_slice %7 {offsets = [0, 384], sizes = [256, 128], strides = [1, 1]} : vector<256x512xf32> to vector<256x128xf32>
    %c253_i32 = arith.constant 253 : i32
    %16 = tpu.dynamic_rotate %15 by %c253_i32 dim 0 : vector<256x128xf32>, i32 -> vector<256x128xf32>
    %17 = arith.addf %14, %16 : vector<256x128xf32>
    %c0_3 = arith.constant 0 : index
    %c0_4 = arith.constant 0 : index
    %18 = vector.load %arg4[%c0_3, %c0_4] : memref<1x128xf32, #tpu.memory_space<vmem>>, vector<1x128xf32>
    %19 = vector.broadcast %18 : vector<1x128xf32> to vector<256x128xf32>
    %20 = arith.addf %17, %19 : vector<256x128xf32>
    %cst_5 = arith.constant 0.000000e+00 : f32
    %21 = vector.broadcast %cst_5 : f32 to vector<256x128xf32>
    %22 = arith.maximumf %20, %21 : vector<256x128xf32>
    %23 = tpu.iota {dimensions = array<i32: 0>} : vector<16x128xi32>
    %24 = tpu.iota {dimensions = array<i32: 1>} : vector<16x128xi32>
    %c8_i32 = arith.constant 8 : i32
    %25 = vector.broadcast %c8_i32 : i32 to vector<16x128xi32>
    %26 = arith.cmpi slt, %24, %25 : vector<16x128xi32>
    %c16_i32 = arith.constant 16 : i32
    %27 = vector.broadcast %c16_i32 : i32 to vector<16x128xi32>
    %28 = arith.cmpi slt, %24, %27 : vector<16x128xi32>
    %c3_i32 = arith.constant 3 : i32
    %c4_i32 = arith.constant 4 : i32
    %29 = vector.broadcast %c3_i32 : i32 to vector<16x128xi32>
    %30 = vector.broadcast %c4_i32 : i32 to vector<16x128xi32>
    %31 = arith.select %28, %29, %30 : vector<16x128xi1>, vector<16x128xi32>
    %c2_i32 = arith.constant 2 : i32
    %32 = vector.broadcast %c2_i32 : i32 to vector<16x128xi32>
    %33 = arith.select %26, %32, %31 : vector<16x128xi1>, vector<16x128xi32>
    %34 = arith.addi %23, %33 : vector<16x128xi32>
    %c16_i32_6 = arith.constant 16 : i32
    %35 = vector.broadcast %c16_i32_6 : i32 to vector<16x128xi32>
    %36 = arith.cmpi sle, %34, %35 : vector<16x128xi32>
    %37 = arith.extui %36 : vector<16x128xi1> to vector<16x128xi32>
    %38 = arith.sitofp %37 : vector<16x128xi32> to vector<16x128xf32>
    %39 = vector.shape_cast %22 : vector<256x128xf32> to vector<16x16x128xf32>
    %40 = vector.shape_cast %38 : vector<16x128xf32> to vector<1x16x128xf32>
    %41 = vector.broadcast %40 : vector<1x16x128xf32> to vector<16x16x128xf32>
    %42 = arith.mulf %39, %41 : vector<16x16x128xf32>
    %cst_7 = arith.constant dense<0xFF800000> : vector<16x128xf32>
    %43 = vector.multi_reduction <maximumf>, %42, %cst_7 [1] : vector<16x16x128xf32> to vector<16x128xf32>
    %c0_8 = arith.constant 0 : index
    %c0_9 = arith.constant 0 : index
    %c0_10 = arith.constant 0 : index
    %44 = vector.load %arg5[%c0_8, %c0_9, %c0_10] : memref<1x128x128xf32, #tpu.memory_space<vmem>>, vector<1x128x128xf32>
    %45 = vector.shape_cast %44 : vector<1x128x128xf32> to vector<128x128xf32>
    %cst_11 = arith.constant dense<0.000000e+00> : vector<16x128xf32>
    %46 = tpu.matmul %43, %45, %cst_11 {dimension_numbers = #tpu.dot_dimension_numbers<[1], [0], [0], [1], [0, 0, 1, 1], [], []>} : vector<16x128xf32>, vector<128x128xf32>, vector<16x128xf32> -> vector<16x128xf32>
    %c0_12 = arith.constant 0 : index
    %c0_13 = arith.constant 0 : index
    %c0_14 = arith.constant 0 : index
    %47 = vector.load %arg6[%c0_12, %c0_13, %c0_14] : memref<1x1x128xf32, #tpu.memory_space<vmem>>, vector<1x1x128xf32>
    %48 = vector.shape_cast %47 : vector<1x1x128xf32> to vector<1x128xf32>
    %49 = vector.broadcast %48 : vector<1x128xf32> to vector<16x128xf32>
    %50 = arith.addf %46, %49 : vector<16x128xf32>
    %c0_15 = arith.constant 0 : index
    %c0_16 = arith.constant 0 : index
    %51 = vector.load %arg7[%c0_15, %c0_16] : memref<16x128xf32, #tpu.memory_space<vmem>>, vector<16x128xf32>
    tpu.vector_store %arg7[%c0_15, %c0_16], %50 {strides = array<i32>} : memref<16x128xf32, #tpu.memory_space<vmem>>, vector<16x128xf32>,
    return
  }
  func.func @transform_0(%arg0: i32, %arg1: memref<1xi32, #tpu.memory_space<smem>>) -> (i32, i32) {
    %c0_i32 = arith.constant 0 : i32
    %c0_i32_0 = arith.constant 0 : i32
    return %arg0, %c0_i32 : i32, i32
  }
  func.func @transform_1(%arg0: i32, %arg1: memref<1xi32, #tpu.memory_space<smem>>) -> (i32, i32) {
    %c0_i32 = arith.constant 0 : i32
    %c0_i32_0 = arith.constant 0 : i32
    %c0_i32_1 = arith.constant 0 : i32
    return %c0_i32, %c0_i32_0 : i32, i32
  }
  func.func @transform_2(%arg0: i32, %arg1: memref<1xi32, #tpu.memory_space<smem>>) -> (i32, i32) {
    %c0_i32 = arith.constant 0 : i32
    %c0_i32_0 = arith.constant 0 : i32
    %c0_i32_1 = arith.constant 0 : i32
    return %c0_i32, %c0_i32_0 : i32, i32
  }
  func.func @transform_3(%arg0: i32, %arg1: memref<1xi32, #tpu.memory_space<smem>>) -> (i32, i32, i32) {
    %c0 = arith.constant 0 : index
    %0 = memref.load %arg1[%c0] : memref<1xi32, #tpu.memory_space<smem>>
    %c0_i32 = arith.constant 0 : i32
    %c0_i32_0 = arith.constant 0 : i32
    %c0_i32_1 = arith.constant 0 : i32
    return %0, %c0_i32, %c0_i32_0 : i32, i32, i32
  }
  func.func @transform_4(%arg0: i32, %arg1: memref<1xi32, #tpu.memory_space<smem>>) -> (i32, i32, i32) {
    %c0 = arith.constant 0 : index
    %0 = memref.load %arg1[%c0] : memref<1xi32, #tpu.memory_space<smem>>
    %c0_i32 = arith.constant 0 : i32
    %c0_i32_0 = arith.constant 0 : i32
    %c0_i32_1 = arith.constant 0 : i32
    return %0, %c0_i32, %c0_i32_0 : i32, i32, i32
  }
  func.func @transform_5(%arg0: i32, %arg1: memref<1xi32, #tpu.memory_space<smem>>) -> (i32, i32) {
    %c0_i32 = arith.constant 0 : i32
    %c0_i32_0 = arith.constant 0 : i32
    return %arg0, %c0_i32 : i32, i32
  }
}

</mosaic_0001>

<bundles_post_ra>
// kernel: tpu_custom_call.1
= control target key start
LH: loop header
LB: loop body
LE: loop exit
PB: predicated region body
PF: predicated region fallthrough
CT: control target
= control target key end

     0   :  { %12 = vsyncpa [#allocation5], 0  ;;  %s2643_s0 = inlined_call_operand.<no memory space> [shape: s32[1], index: 0, kind: input, shape index: {}]   ;;  %s2644_s1 = inlined_call_operand.vmem [shape: s32[256,1], index: 1, kind: input, shape index: {}]   ;;  %s2645_s2 = inlined_call_operand.hbm [shape: f32[100,512], index: 2, kind: input, shape index: {}]   ;;  %s2646_s3 = inlined_call_operand.hbm [shape: f32[1,128], index: 3, kind: input, shape index: {}]   ;;  %s2647_s4 = inlined_call_operand.vmem [shape: f32[2,128,128], index: 4, kind: input, shape index: {}]   ;;  %s2648_s5 = inlined_call_operand.vmem [shape: f32[2,1,128], index: 5, kind: input, shape index: {}]   ;;  %s2649_s6 = inlined_call_operand.hbm [shape: f32[16,128], index: 6, kind: output, shape index: {}]  }
   0x1   :  { %13 = vsyncpa [#allocation8], 0 }
   0x2   :  { %14 = vsyncpa [#allocation6], 0  ;;  %s21_s23 = sshll.u32 %s2645_s2, 4  ;;  %s1837_s24 = smov [#allocation4]   ;;  %s22_s23 = int_to_ptr.hbm [resolvable:$true] %s21_s23 }
   0x3   :  { %s23_s25 = sshll.u32 %s1837_s24, 4  ;;  %s35_s28 = sshll.u32 %s2646_s3, 4  ;;  %s24_s25 = int_to_ptr.vmem [resolvable:$true] %s23_s25  ;;  %s36_s28 = int_to_ptr.hbm [resolvable:$true] %s35_s28 }
   0x4   :  { %s1838_s29 = smov 512   ;;  %s1839_s30 = smov 32  }
   0x5   :  { %29 = dma.hbm_to_vmem [thread:$0]  %s22_s23, 6656, %s24_s25, [#allocation5], %s1838_s29, %s1838_s29, %s1839_s30  }
   0x6   :  { %s1840_s7 = smov [#allocation7]  }
   0x7   :  { %s37_s8 = sshll.u32 %s1840_s7, 4  ;;  %s38_s8 = int_to_ptr.vmem [resolvable:$true] %s37_s8 }
   0x8   :  { %40 = dma.hbm_to_vmem [thread:$0]  %s36_s28, 16, %s38_s8, [#allocation8]  }
   0x9   :  { %1831 = dma.done.wait [#allocation5], 6656  }
   0xa   :  { %1832 = vsyncadd [#allocation5], 4294960640 }
   0xb   :  { %1833 = dma.done.wait [#allocation8], 16  }
   0xc   :  { %1834 = vsyncadd [#allocation8], 4294967280  ;;  %v1841_v0 = vmov 0   ;;  %v91_v1 = vld [vmem:[%s2644_s1 + $0x20] sm:$0xff]  ;;  %v89_v2 = vld [vmem:[%s2644_s1 + $0x10] sm:$0xff]  ;;  %vm462_vm0 = vcmask 1043456  }
   0xd   :  { %1755 = vset.pattern.permute.xlu2 %v1841_v0  ;;  %1754 = vset.pattern.permute.xlu1 %v1841_v0  ;;  %v87_v3 = vld [vmem:[%s2644_s1] sm:$0xff]  ;;  %v92_v4 = vld [vmem:[%s2644_s1 + $0x28] sm:$0xff]  ;;  %v90_v5 = vld [vmem:[%s2644_s1 + $0x18] sm:$0xff]  ;;  %vm365_vm1 = vcmask 818176   ;;  %p76_p0 = scmp.lt.s32.totalorder %s2643_s0, 1  ;;  %s1844_s30 = smov [#allocation9]  }
   0xe   :  { %1753 = vset.pattern.permute.xlu0 %v1841_v0  ;;  %134 = vperm.xlu2 %1755, %v91_v1   ;;  %v88_v6 = vld [vmem:[%s2644_s1 + $0x8] sm:$0xff]  ;;  %v95_v7 = vld [vmem:[%s2644_s1 + $0x40] sm:$0xff]  ;;  %v94_v8 = vld [vmem:[%s2644_s1 + $0x38] sm:$0xff]  ;;  %s1533_s7 = sshll.u32 %s1844_s30, 4  ;;  %s1535_s9 = sshll.u32 %s2649_s6, 4  ;;  %s1534_s7 = int_to_ptr.vmem [resolvable:$true] %s1533_s7  ;;  %s1536_s9 = int_to_ptr.hbm [resolvable:$true] %s1535_s9 }
   0xf   :  { %128 = vperm.xlu1 %1754, %v89_v2   ;;  %122 = vperm.xlu0 %1753, %v87_v3   ;;  %v93_v9 = vld [vmem:[%s2644_s1 + $0x30] sm:$0xff]  ;;  %v98_v10 = vld [vmem:[%s2644_s1 + $0x58] sm:$0xff]  ;;  %v96_v12 = vld [vmem:[%s2644_s1 + $0x48] sm:$0xff]  ;;  %s2651_s0 = smov (!%p76_p0, %s2643_s0), 1  ;;  %s1845_s3 = smov 128  }
  0x10   :  { %v97_v11 = vld [vmem:[%s2644_s1 + $0x50] sm:$0xff]  ;;  %v100_v14 = vld [vmem:[%s2644_s1 + $0x68] sm:$0xff]  ;;  %v99_v15 = vld [vmem:[%s2644_s1 + $0x60] sm:$0xff]  ;;  %s1726_s22 = sshll.u32 %s2651_s0, 7  ;;  %s85_s27 = scalar_lea.vmem %s2648_s5, %s2651_s0 }
  0x11   :  { %v101_v13 = vld [vmem:[%s2644_s1 + $0x70] sm:$0xff]  ;;  %v104_v16 = vld [vmem:[%s2644_s1 + $0x88] sm:$0xff]  ;;  %v103_v17 = vld [vmem:[%s2644_s1 + $0x80] sm:$0xff]  ;;  %s2122_s25 = scalar_lea.vmem %s2647_s4, %s1726_s22  ;;  %s1846_s10 = smov 8  }
  0x12   :  { %v102_v18 = vld [vmem:[%s2644_s1 + $0x78] sm:$0xff]  ;;  %v107_v19 = vld [vmem:[%s2644_s1 + $0xa0] sm:$0xff]  ;;  %v105_v21 = vld [vmem:[%s2644_s1 + $0x90] sm:$0xff] }
  0x13   :  { %v106_v20 = vld [vmem:[%s2644_s1 + $0x98] sm:$0xff]  ;;  %v109_v23 = vld [vmem:[%s2644_s1 + $0xb0] sm:$0xff]  ;;  %v108_v24 = vld [vmem:[%s2644_s1 + $0xa8] sm:$0xff] }
  0x14   :  { %v110_v22 = vld [vmem:[%s2644_s1 + $0xb8] sm:$0xff]  ;;  %v113_v25 = vld [vmem:[%s2644_s1 + $0xd0] sm:$0xff]  ;;  %v112_v26 = vld [vmem:[%s2644_s1 + $0xc8] sm:$0xff] }
  0x15   :  { %v361_v27 = vld [vmem:[#allocation4 + $0x180] sm:$0xf]  ;;  %v362_v28 = vld [vmem:[#allocation4 + $0x188] sm:$0xf]  ;;  %v363_v30 = vld [vmem:[#allocation4 + $0x190] sm:$0xf] }
  0x16   :  { %137 = vperm.xlu2 %1755, %v92_v4   ;;  %v357_v29 = vld [vmem:[#allocation4 + $0x160] sm:$0xff]  ;;  %1592 = vmatpush.msk.msra.mxu0 %vm462_vm0, %v361_v27  ;;  %v364_v31 = vld [vmem:[#allocation4 + $0x198] sm:$0xf]  ;;  %v358_v32 = vld [vmem:[#allocation4 + $0x168] sm:$0xff] }
  0x17   :  { %131 = vperm.xlu1 %1754, %v90_v5   ;;  %125 = vperm.xlu0 %1753, %v88_v6   ;;  %v111_v33 = vld [vmem:[%s2644_s1 + $0xc0] sm:$0xff]  ;;  %v359_v34 = vld [vmem:[#allocation4 + $0x170] sm:$0xff]  ;;  %v360_v35 = vld [vmem:[#allocation4 + $0x178] sm:$0xff] }
  0x18   :  { %1625 = vmatpush.msk.msra.mxu1 %vm462_vm0, %v362_v28  ;;  %1658 = vmatpush.msk.msra.mxu2 %vm462_vm0, %v363_v30  ;;  %v353_v36 = vld [vmem:[#allocation4 + $0x140] sm:$0xff]  ;;  %v354_v37 = vld [vmem:[#allocation4 + $0x148] sm:$0xff]  ;;  %v355_v38 = vld [vmem:[#allocation4 + $0x150] sm:$0xff] }
  0x19   :  { %1691 = vmatpush.msk.msra.mxu3 %vm462_vm0, %v364_v31  ;;  %479 = vmatpush.msra.mxu0 %v357_v29  ;;  %v356_v39 = vld [vmem:[#allocation4 + $0x158] sm:$0xff]  ;;  %v349_v40 = vld [vmem:[#allocation4 + $0x120] sm:$0xff]  ;;  %v350_v41 = vld [vmem:[#allocation4 + $0x128] sm:$0xff] }
  0x1a   :  { %592 = vmatpush.msra.mxu1 %v358_v32  ;;  %705 = vmatpush.msra.mxu2 %v359_v34  ;;  %v351_v42 = vld [vmem:[#allocation4 + $0x130] sm:$0xff]  ;;  %v352_v43 = vld [vmem:[#allocation4 + $0x138] sm:$0xff]  ;;  %v345_v44 = vld [vmem:[#allocation4 + $0x100] sm:$0xff] }
  0x1b   :  { %818 = vmatpush.msra.mxu3 %v360_v35  ;;  %480 = vmatpush.msra.mxu0 %v353_v36  ;;  %v346_v45 = vld [vmem:[#allocation4 + $0x108] sm:$0xff]  ;;  %v347_v46 = vld [vmem:[#allocation4 + $0x110] sm:$0xff]  ;;  %v115_v48 = vld [vmem:[%s2644_s1 + $0xe0] sm:$0xff] }
  0x1c   :  { %593 = vmatpush.msra.mxu1 %v354_v37  ;;  %706 = vmatpush.msra.mxu2 %v355_v38  ;;  %v116_v47 = vld [vmem:[%s2644_s1 + $0xe8] sm:$0xff]  ;;  %v114_v49 = vld [vmem:[%s2644_s1 + $0xd8] sm:$0xff]  ;;  %v341_v51 = vld [vmem:[#allocation4 + $0xe0] sm:$0xff] }
  0x1d   :  { %819 = vmatpush.msra.mxu3 %v356_v39  ;;  %481 = vmatpush.msra.mxu0 %v349_v40  ;;  %v348_v50 = vld [vmem:[#allocation4 + $0x118] sm:$0xff]  ;;  %v342_v52 = vld [vmem:[#allocation4 + $0xe8] sm:$0xff]  ;;  %v343_v53 = vld [vmem:[#allocation4 + $0xf0] sm:$0xff] }
  0x1e   :  { %146 = vperm.xlu2 %1755, %v95_v7   ;;  %594 = vmatpush.msra.mxu1 %v350_v41  ;;  %v344_v54 = vld [vmem:[#allocation4 + $0xf8] sm:$0xff]  ;;  %v337_v55 = vld [vmem:[#allocation4 + $0xc0] sm:$0xff]  ;;  %v338_v56 = vld [vmem:[#allocation4 + $0xc8] sm:$0xff] }
  0x1f   :  { %143 = vperm.xlu1 %1754, %v94_v8   ;;  %140 = vperm.xlu0 %1753, %v93_v9   ;;  %v339_v57 = vld [vmem:[#allocation4 + $0xd0] sm:$0xff]  ;;  %v340_v58 = vld [vmem:[#allocation4 + $0xd8] sm:$0xff]  ;;  %v333_v59 = vld [vmem:[#allocation4 + $0xa0] sm:$0xff] }
  0x20   :  { %707 = vmatpush.msra.mxu2 %v351_v42  ;;  %820 = vmatpush.msra.mxu3 %v352_v43  ;;  %v334_v60 = vld [vmem:[#allocation4 + $0xa8] sm:$0xff]  ;;  %v335_v61 = vld [vmem:[#allocation4 + $0xb0] sm:$0xff]  ;;  %v336_v62 = vld [vmem:[#allocation4 + $0xb8] sm:$0xff] }
  0x21   :  { %482 = vmatpush.msra.mxu0 %v345_v44  ;;  %595 = vmatpush.msra.mxu1 %v346_v45  ;;  %v118_v63 = vld [vmem:[%s2644_s1 + $0xf8] sm:$0xff]  ;;  %v329_v0 = vld [vmem:[#allocation4 + $0x80] sm:$0xff]  ;;  %v117_v1 = vld [vmem:[%s2644_s1 + $0xf0] sm:$0xff] }
  0x22   :  { %708 = vmatpush.msra.mxu2 %v347_v46  ;;  %821 = vmatpush.msra.mxu3 %v348_v50  ;;  %v330_v2 = vld [vmem:[#allocation4 + $0x88] sm:$0xff]  ;;  %v331_v3 = vld [vmem:[#allocation4 + $0x90] sm:$0xff]  ;;  %v332_v4 = vld [vmem:[#allocation4 + $0x98] sm:$0xff] }
  0x23   :  { %483 = vmatpush.msra.mxu0 %v341_v51  ;;  %596 = vmatpush.msra.mxu1 %v342_v52  ;;  %v325_v5 = vld [vmem:[#allocation4 + $0x60] sm:$0xff]  ;;  %v326_v6 = vld [vmem:[#allocation4 + $0x68] sm:$0xff]  ;;  %v327_v7 = vld [vmem:[#allocation4 + $0x70] sm:$0xff] }
  0x24   :  { %709 = vmatpush.msra.mxu2 %v343_v53  ;;  %822 = vmatpush.msra.mxu3 %v344_v54  ;;  %v328_v8 = vld [vmem:[#allocation4 + $0x78] sm:$0xff]  ;;  %v321_v9 = vld [vmem:[#allocation4 + $0x40] sm:$0xff] }
  0x25   :  { %484 = vmatpush.msra.mxu0 %v337_v55  ;;  %597 = vmatpush.msra.mxu1 %v338_v56 }
  0x26   :  { %155 = vperm.xlu2 %1755, %v98_v10   ;;  %710 = vmatpush.msra.mxu2 %v339_v57  ;;  %v322_v10 = vld [vmem:[#allocation4 + $0x48] sm:$0xff] }
  0x27   :  { %152 = vperm.xlu1 %1754, %v97_v11   ;;  %149 = vperm.xlu0 %1753, %v96_v12   ;;  %v323_v11 = vld [vmem:[#allocation4 + $0x50] sm:$0xff]  ;;  %v324_v12 = vld [vmem:[#allocation4 + $0x58] sm:$0xff] }
  0x28   :  { %823 = vmatpush.msra.mxu3 %v340_v58  ;;  %485 = vmatpush.msra.mxu0 %v333_v59 }
  0x29   :  { %598 = vmatpush.msra.mxu1 %v334_v60  ;;  %711 = vmatpush.msra.mxu2 %v335_v61 }
  0x2a   :  { %824 = vmatpush.msra.mxu3 %v336_v62  ;;  %486 = vmatpush.msra.mxu0 %v329_v0 }
  0x2b   :  { %599 = vmatpush.msra.mxu1 %v330_v2  ;;  %712 = vmatpush.msra.mxu2 %v331_v3 }
  0x2c   :  { %825 = vmatpush.msra.mxu3 %v332_v4  ;;  %487 = vmatpush.msra.mxu0 %v325_v5 }
  0x2d   :  { %600 = vmatpush.msra.mxu1 %v326_v6  ;;  %713 = vmatpush.msra.mxu2 %v327_v7 }
  0x2e   :  { %164 = vperm.xlu2 %1755, %v101_v13   ;;  %826 = vmatpush.msra.mxu3 %v328_v8  ;;  %v317_v13 = vld [vmem:[#allocation4 + $0x20] sm:$0xff] }
  0x2f   :  { %161 = vperm.xlu1 %1754, %v100_v14   ;;  %158 = vperm.xlu0 %1753, %v99_v15   ;;  %v318_v14 = vld [vmem:[#allocation4 + $0x28] sm:$0xff]  ;;  %v319_v15 = vld [vmem:[#allocation4 + $0x30] sm:$0xff] }
  0x30   :  { %488 = vmatpush.msra.mxu0 %v321_v9  ;;  %601 = vmatpush.msra.mxu1 %v322_v10 }
  0x31   :  { %714 = vmatpush.msra.mxu2 %v323_v11  ;;  %827 = vmatpush.msra.mxu3 %v324_v12 }
  0x32   :  { %489 = vmatpush.msra.mxu0 %v317_v13  ;;  %602 = vmatpush.msra.mxu1 %v318_v14 }
  0x33   :  { %715 = vmatpush.msra.mxu2 %v319_v15  ;;  %v1460_v15 = vld [vmem:[%s2122_s25 + $0x78] sm:$0xff] }
  0x36   :  { %173 = vperm.xlu2 %1755, %v104_v16   ;;  %v320_v16 = vld [vmem:[#allocation4 + $0x38] sm:$0xff] }
  0x37   :  { %170 = vperm.xlu1 %1754, %v103_v17   ;;  %167 = vperm.xlu0 %1753, %v102_v18   ;;  %v313_v17 = vld [vmem:[#allocation4] sm:$0xff]  ;;  %v314_v18 = vld [vmem:[#allocation4 + $0x8] sm:$0xff] }
  0x38   :  { %828 = vmatpush.msra.mxu3 %v320_v16  ;;  %490 = vmatpush.msra.mxu0 %v313_v17 }
  0x39   :  { %603 = vmatpush.msra.mxu1 %v314_v18 }
  0x3a   :  { %1504 = vmatpush.msrb.mxu0 %v1460_v15 }
  0x3b   :  { %1727 = vmatpush.msrb.mxu1 %v1460_v15 }
  0x3e   :  { %182 = vperm.xlu2 %1755, %v107_v19   ;;  %v315_v19 = vld [vmem:[#allocation4 + $0x10] sm:$0xff] }
  0x3f   :  { %179 = vperm.xlu1 %1754, %v106_v20   ;;  %176 = vperm.xlu0 %1753, %v105_v21   ;;  %v316_v20 = vld [vmem:[#allocation4 + $0x18] sm:$0xff]  ;;  %v119_v21 = vlaneseq }
  0x40   :  { %716 = vmatpush.msra.mxu2 %v315_v19  ;;  %829 = vmatpush.msra.mxu3 %v316_v20 }
  0x46   :  { %191 = vperm.xlu2 %1755, %v110_v22   ;;  %v1985_v22 = vand.u32 127, %v119_v21 }
  0x47   :  { %188 = vperm.xlu1 %1754, %v109_v23   ;;  %185 = vperm.xlu0 %1753, %v108_v24   ;;  %v1842_v24 = vmov 0.0  }
  0x4e   :  { %200 = vperm.xlu2 %1755, %v113_v25  }
  0x4f   :  { %197 = vperm.xlu1 %1754, %v112_v26   ;;  %194 = vperm.xlu0 %1753, %v111_v33  }
  0x56   :  { %209 = vperm.xlu2 %1755, %v116_v47  }
  0x57   :  { %206 = vperm.xlu1 %1754, %v115_v48   ;;  %203 = vperm.xlu0 %1753, %v114_v49  }
  0x5f   :  { %215 = vperm.xlu1 %1754, %v118_v63   ;;  %212 = vperm.xlu0 %1753, %v117_v1   ;;  %v2100_v63 = vshrl.u32 %v119_v21, 7  ;;  %v1843_v21 = vmov 4  }
  0x68   :  { %v135_v32 = vpop.permute.xlu2 %134 }
  0x69   :  { %vm221_vm6 = vcmp.eq.s32.totalorder %v1985_v22, %v135_v32 }
  0x6a   :  { %v1564_v33 = vsel %vm221_vm6, 1.0, %v1842_v24 }
  0x70   :  { %v138_v34 = vpop.permute.xlu2 %137 }
  0x71   :  { %vm222_vm7 = vcmp.eq.s32.totalorder %v1985_v22, %v138_v34 }
  0x72   :  { %v1565_v35 = vsel %vm222_vm7, 1.0, %v1842_v24  ;;  %vm1058_vm7 = vcmp.lt.s32.totalorder %v2100_v63, 6 }
  0x78   :  { %v147_v40 = vpop.permute.xlu2 %146 }
  0x79   :  { %vm225_vm10 = vcmp.eq.s32.totalorder %v1985_v22, %v147_v40 }
  0x7a   :  { %v1568_v41 = vsel %vm225_vm10, 1.0, %v1842_v24  ;;  %vm1289_vm10 = vcmp.lt.s32.totalorder %v1985_v22, 8 }
  0x80   :  { %v156_v46 = vpop.permute.xlu2 %155 }
  0x81   :  { %v123_v23 = vpop.permute.xlu0 %122  ;;  %v129_v28 = vpop.permute.xlu1 %128  ;;  %vm228_vm13 = vcmp.eq.s32.totalorder %v1985_v22, %v156_v46 }
  0x82   :  { %vm217_vm2 = vcmp.eq.s32.totalorder %v1985_v22, %v123_v23  ;;  %vm219_vm4 = vcmp.eq.s32.totalorder %v1985_v22, %v129_v28  ;;  %v1571_v47 = vsel %vm228_vm13, 1.0, %v1842_v24  ;;  %v1288_v28 = vadd.s32 8, %v2100_v63 }
  0x83   :  { %v1560_v25 = vsel %vm217_vm2, 1.0, %v1842_v24  ;;  %v1562_v29 = vsel %vm219_vm4, 1.0, %v1842_v24 }
  0x84   :  { %1593 = vmatmul.msk.f32.vlgmr.msra.gmra.mxu0 %vm365_vm1, %v1560_v25  ;;  %1626 = vmatmul.msk.f32.vlgmr.msra.gmra.mxu1 %vm365_vm1, %v1560_v25 }
  0x85   :  { %1659 = vmatmul.msk.f32.vlgmr.msra.gmra.mxu2 %vm365_vm1, %v1560_v25  ;;  %1692 = vmatmul.msk.f32.vlgmr.msra.gmra.mxu3 %vm365_vm1, %v1560_v25 }
  0x88   :  { %v165_v52 = vpop.permute.xlu2 %164 }
  0x89   :  { %v126_v26 = vpop.permute.xlu0 %125  ;;  %v132_v30 = vpop.permute.xlu1 %131  ;;  %vm231_vm0 = vcmp.eq.s32.totalorder %v1985_v22, %v165_v52 }
  0x8a   :  { %vm218_vm3 = vcmp.eq.s32.totalorder %v1985_v22, %v126_v26  ;;  %vm220_vm5 = vcmp.eq.s32.totalorder %v1985_v22, %v132_v30  ;;  %v1574_v53 = vsel %vm231_vm0, 1.0, %v1842_v24 }
  0x8b   :  { %v1561_v27 = vsel %vm218_vm3, 1.0, %v1842_v24  ;;  %v1563_v31 = vsel %vm220_vm5, 1.0, %v1842_v24  ;;  %vm961_vm5 = vcmp.lt.s32.totalorder %v2100_v63, 7 }
  0x8c   :  { %1594 = vmatmul.msk.f32.gmra.mxu0 %vm365_vm1, %v1561_v27  ;;  %1627 = vmatmul.msk.f32.gmra.mxu1 %vm365_vm1, %v1561_v27 }
  0x8d   :  { %1660 = vmatmul.msk.f32.gmra.mxu2 %vm365_vm1, %v1561_v27  ;;  %1693 = vmatmul.msk.f32.gmra.mxu3 %vm365_vm1, %v1561_v27 }
  0x90   :  { %v174_v60 = vpop.permute.xlu2 %173 }
  0x91   :  { %v141_v36 = vpop.permute.xlu0 %140  ;;  %v144_v38 = vpop.permute.xlu1 %143  ;;  %vm234_vm4 = vcmp.eq.s32.totalorder %v1985_v22, %v174_v60 }
  0x92   :  { %vm223_vm8 = vcmp.eq.s32.totalorder %v1985_v22, %v141_v36  ;;  %vm224_vm9 = vcmp.eq.s32.totalorder %v1985_v22, %v144_v38  ;;  %v1577_v2 = vsel %vm234_vm4, 1.0, %v1842_v24  ;;  %vm1481_vm4 = vcmask 1041409  }
  0x93   :  { %v1566_v37 = vsel %vm223_vm8, 1.0, %v1842_v24  ;;  %v1567_v39 = vsel %vm224_vm9, 1.0, %v1842_v24  ;;  %vm1290_vm8 = vcmp.lt.s32.totalorder %v1985_v22, 16  ;;  %vm1155_vm9 = vcmp.lt.s32.totalorder %v2100_v63, 5 }
  0x94   :  { %1595 = vmatmul.msk.f32.gmra.mxu0 %vm365_vm1, %v1562_v29  ;;  %1628 = vmatmul.msk.f32.gmra.mxu1 %vm365_vm1, %v1562_v29  ;;  %v1291_v23 = vsel %vm1290_vm8, 3, %v1843_v21 }
  0x95   :  { %1661 = vmatmul.msk.f32.gmra.mxu2 %vm365_vm1, %v1562_v29  ;;  %1694 = vmatmul.msk.f32.gmra.mxu3 %vm365_vm1, %v1562_v29  ;;  %v1292_v29 = vsel %vm1289_vm10, 2, %v1291_v23  ;;  %vm1483_vm10 = vcmask 1042434  }
  0x96   :  { %v1293_v38 = vadd.s32 %v1292_v29, %v2100_v63  ;;  %v1294_v40 = vadd.s32 %v1292_v29, %v1288_v28 }
  0x98   :  { %vm1296_vm13 = vcmp.le.s32.totalorder %v1294_v40, 16 }
  0x99   :  { %v150_v42 = vpop.permute.xlu0 %149  ;;  %v153_v44 = vpop.permute.xlu1 %152 }
  0x9a   :  { %vm226_vm11 = vcmp.eq.s32.totalorder %v1985_v22, %v150_v42  ;;  %vm227_vm12 = vcmp.eq.s32.totalorder %v1985_v22, %v153_v44 }
  0x9b   :  { %v1569_v43 = vsel %vm226_vm11, 1.0, %v1842_v24  ;;  %v1570_v45 = vsel %vm227_vm12, 1.0, %v1842_v24  ;;  %vm1295_vm12 = vcmp.le.s32.totalorder %v1293_v38, 16 }
  0x9c   :  { %1596 = vmatmul.msk.f32.gmra.mxu0 %vm365_vm1, %v1563_v31  ;;  %1629 = vmatmul.msk.f32.gmra.mxu1 %vm365_vm1, %v1563_v31 }
  0x9d   :  { %1662 = vmatmul.msk.f32.gmra.mxu2 %vm365_vm1, %v1563_v31  ;;  %1695 = vmatmul.msk.f32.gmra.mxu3 %vm365_vm1, %v1563_v31  ;;  %v2153_v31 = vld [vmem:[#allocation7] ss:$0 sm:$0xff] }
  0xa1   :  { %v159_v48 = vpop.permute.xlu0 %158  ;;  %v162_v50 = vpop.permute.xlu1 %161 }
  0xa2   :  { %vm229_vm14 = vcmp.eq.s32.totalorder %v1985_v22, %v159_v48  ;;  %vm230_vm15 = vcmp.eq.s32.totalorder %v1985_v22, %v162_v50  ;;  %v183_v48 = vpop.permute.xlu2 %182 }
  0xa3   :  { %v1572_v49 = vsel %vm229_vm14, 1.0, %v1842_v24  ;;  %v1573_v51 = vsel %vm230_vm15, 1.0, %v1842_v24  ;;  %vm237_vm14 = vcmp.eq.s32.totalorder %v1985_v22, %v183_v48 }
  0xa4   :  { %1597 = vmatmul.msk.f32.gmra.mxu0 %vm365_vm1, %v1564_v33  ;;  %1630 = vmatmul.msk.f32.gmra.mxu1 %vm365_vm1, %v1564_v33 }
  0xa5   :  { %1663 = vmatmul.msk.f32.gmra.mxu2 %vm365_vm1, %v1564_v33  ;;  %1696 = vmatmul.msk.f32.gmra.mxu3 %vm365_vm1, %v1564_v33 }
  0xa9   :  { %v168_v54 = vpop.permute.xlu0 %167  ;;  %v171_v56 = vpop.permute.xlu1 %170 }
  0xaa   :  { %vm232_vm2 = vcmp.eq.s32.totalorder %v1985_v22, %v168_v54  ;;  %vm233_vm3 = vcmp.eq.s32.totalorder %v1985_v22, %v171_v56  ;;  %v2171_v54 = vsel %vm1295_vm12, 1.0, %v1842_v24 }
  0xab   :  { %v1575_v55 = vsel %vm232_vm2, 1.0, %v1842_v24  ;;  %v1576_v59 = vsel %vm233_vm3, 1.0, %v1842_v24 }
  0xac   :  { %1598 = vmatmul.msk.f32.gmra.mxu0 %vm365_vm1, %v1565_v35  ;;  %1631 = vmatmul.msk.f32.gmra.mxu1 %vm365_vm1, %v1565_v35 }
  0xad   :  { %1664 = vmatmul.msk.f32.gmra.mxu2 %vm365_vm1, %v1565_v35  ;;  %1697 = vmatmul.msk.f32.gmra.mxu3 %vm365_vm1, %v1565_v35 }
  0xb1   :  { %v177_v4 = vpop.permute.xlu0 %176  ;;  %v180_v25 = vpop.permute.xlu1 %179 }
  0xb2   :  { %vm235_vm6 = vcmp.eq.s32.totalorder %v1985_v22, %v177_v4  ;;  %vm236_vm11 = vcmp.eq.s32.totalorder %v1985_v22, %v180_v25 }
  0xb3   :  { %v1578_v16 = vsel %vm235_vm6, 1.0, %v1842_v24 }
  0xb4   :  { %1599 = vmatmul.msk.f32.gmra.mxu0 %vm365_vm1, %v1566_v37  ;;  %1632 = vmatmul.msk.f32.gmra.mxu1 %vm365_vm1, %v1566_v37 }
  0xb5   :  { %1665 = vmatmul.msk.f32.gmra.mxu2 %vm365_vm1, %v1566_v37  ;;  %1698 = vmatmul.msk.f32.gmra.mxu3 %vm365_vm1, %v1566_v37 }
  0xbc   :  { %1600 = vmatmul.msk.f32.gmra.mxu0 %vm365_vm1, %v1567_v39  ;;  %1633 = vmatmul.msk.f32.gmra.mxu1 %vm365_vm1, %v1567_v39 }
  0xbd   :  { %1666 = vmatmul.msk.f32.gmra.mxu2 %vm365_vm1, %v1567_v39  ;;  %1699 = vmatmul.msk.f32.gmra.mxu3 %vm365_vm1, %v1567_v39 }
  0xc4   :  { %1601 = vmatmul.msk.f32.gmra.mxu0 %vm365_vm1, %v1568_v41  ;;  %1634 = vmatmul.msk.f32.gmra.mxu1 %vm365_vm1, %v1568_v41 }
  0xc5   :  { %1667 = vmatmul.msk.f32.gmra.mxu2 %vm365_vm1, %v1568_v41  ;;  %1700 = vmatmul.msk.f32.gmra.mxu3 %vm365_vm1, %v1568_v41  ;;  %v1579_v41 = vsel %vm236_vm11, 1.0, %v1842_v24 }
  0xcc   :  { %1602 = vmatmul.msk.f32.gmra.mxu0 %vm365_vm1, %v1569_v43  ;;  %1635 = vmatmul.msk.f32.gmra.mxu1 %vm365_vm1, %v1569_v43 }
  0xcd   :  { %1668 = vmatmul.msk.f32.gmra.mxu2 %vm365_vm1, %v1569_v43  ;;  %1701 = vmatmul.msk.f32.gmra.mxu3 %vm365_vm1, %v1569_v43 }
  0xd4   :  { %1603 = vmatmul.msk.f32.gmra.mxu0 %vm365_vm1, %v1570_v45  ;;  %1636 = vmatmul.msk.f32.gmra.mxu1 %vm365_vm1, %v1570_v45 }
  0xd5   :  { %1669 = vmatmul.msk.f32.gmra.mxu2 %vm365_vm1, %v1570_v45  ;;  %1702 = vmatmul.msk.f32.gmra.mxu3 %vm365_vm1, %v1570_v45 }
  0xdc   :  { %1604 = vmatmul.msk.f32.gmra.mxu0 %vm365_vm1, %v1571_v47  ;;  %1637 = vmatmul.msk.f32.gmra.mxu1 %vm365_vm1, %v1571_v47 }
  0xdd   :  { %1670 = vmatmul.msk.f32.gmra.mxu2 %vm365_vm1, %v1571_v47  ;;  %1703 = vmatmul.msk.f32.gmra.mxu3 %vm365_vm1, %v1571_v47 }
  0xe4   :  { %1605 = vmatmul.msk.f32.gmra.mxu0 %vm365_vm1, %v1572_v49  ;;  %1638 = vmatmul.msk.f32.gmra.mxu1 %vm365_vm1, %v1572_v49 }
  0xe5   :  { %1671 = vmatmul.msk.f32.gmra.mxu2 %vm365_vm1, %v1572_v49  ;;  %1704 = vmatmul.msk.f32.gmra.mxu3 %vm365_vm1, %v1572_v49 }
  0xec   :  { %1606 = vmatmul.msk.f32.gmra.mxu0 %vm365_vm1, %v1573_v51  ;;  %1639 = vmatmul.msk.f32.gmra.mxu1 %vm365_vm1, %v1573_v51 }
  0xed   :  { %1672 = vmatmul.msk.f32.gmra.mxu2 %vm365_vm1, %v1573_v51  ;;  %1705 = vmatmul.msk.f32.gmra.mxu3 %vm365_vm1, %v1573_v51 }
  0xf4   :  { %1607 = vmatmul.msk.f32.gmra.mxu0 %vm365_vm1, %v1574_v53  ;;  %1640 = vmatmul.msk.f32.gmra.mxu1 %vm365_vm1, %v1574_v53 }
  0xf5   :  { %1673 = vmatmul.msk.f32.gmra.mxu2 %vm365_vm1, %v1574_v53  ;;  %1706 = vmatmul.msk.f32.gmra.mxu3 %vm365_vm1, %v1574_v53 }
  0xfc   :  { %1608 = vmatmul.msk.f32.gmra.mxu0 %vm365_vm1, %v1575_v55  ;;  %1641 = vmatmul.msk.f32.gmra.mxu1 %vm365_vm1, %v1575_v55 }
  0xfd   :  { %1674 = vmatmul.msk.f32.gmra.mxu2 %vm365_vm1, %v1575_v55  ;;  %1707 = vmatmul.msk.f32.gmra.mxu3 %vm365_vm1, %v1575_v55  ;;  %v2174_v55 = vsel %vm1296_vm13, 1.0, %v1842_v24  ;;  %vm1485_vm13 = vcmask 1043459  }
 0x101   :  { %v492_v57 = vpop.f32.mrf.mxu0  ;;  %v2084_v58 = vpop.f32.mrf.mxu1 }
 0x102   :  { %v927_v5 = vrot.slane %v2084_v58, 1 }
 0x104   :  { %1609 = vmatmul.msk.f32.gmra.mxu0 %vm365_vm1, %v1576_v59  ;;  %1642 = vmatmul.msk.f32.gmra.mxu1 %vm365_vm1, %v1576_v59 }
 0x105   :  { %1675 = vmatmul.msk.f32.gmra.mxu2 %vm365_vm1, %v1576_v59  ;;  %1708 = vmatmul.msk.f32.gmra.mxu3 %vm365_vm1, %v1576_v59 }
 0x108   :  { %v2095_v61 = vpop.f32.mrf.mxu2  ;;  %v2097_v62 = vpop.f32.mrf.mxu3 }
 0x109   :  { %v495_v0 = vpop.f32.mrf.mxu0  ;;  %v608_v1 = vpop.f32.mrf.mxu1  ;;  %v1026_v9 = vrot.slane %v2095_v61, 2  ;;  %v1123_v17 = vrot.slane %v2097_v62, 3 }
 0x10a   :  { %v928_v3 = vrot.slane %v608_v1, 1 }
 0x10c   :  { %1610 = vmatmul.msk.f32.gmra.mxu0 %vm365_vm1, %v1577_v2  ;;  %1643 = vmatmul.msk.f32.gmra.mxu1 %vm365_vm1, %v1577_v2  ;;  %v992_v6 = vsel %vm961_vm5, %v927_v5, %v928_v3 }
 0x10d   :  { %1676 = vmatmul.msk.f32.gmra.mxu2 %vm365_vm1, %v1577_v2  ;;  %1709 = vmatmul.msk.f32.gmra.mxu3 %vm365_vm1, %v1577_v2  ;;  %v994_v14 = vadd.f32 %v992_v6, %v492_v57  ;;  %v1459_v2 = vld [vmem:[%s2122_s25 + $0x70] sm:$0xff] }
 0x10e   :  { %1505 = vmatpush.msrb.mxu0 %v1459_v2  ;;  %1728 = vmatpush.msrb.mxu1 %v1459_v2 }
 0x110   :  { %v721_v7 = vpop.f32.mrf.mxu2  ;;  %v834_v8 = vpop.f32.mrf.mxu3 }
 0x111   :  { %v1027_v10 = vrot.slane %v721_v7, 2  ;;  %v1124_v11 = vrot.slane %v834_v8, 3  ;;  %v2128_v12 = vpop.f32.mrf.mxu0  ;;  %v611_v13 = vpop.f32.mrf.mxu1 }
 0x112   :  { %v929_v19 = vrot.slane %v611_v13, 1 }
 0x113   :  { %v1089_v18 = vsel %vm1058_vm7, %v1026_v9, %v1027_v10  ;;  %v1186_v26 = vsel %vm1155_vm9, %v1123_v17, %v1124_v11 }
 0x114   :  { %v1091_v20 = vadd.f32 %v1089_v18, %v994_v14  ;;  %1611 = vmatmul.msk.f32.gmra.mxu0 %vm365_vm1, %v1578_v16  ;;  %1644 = vmatmul.msk.f32.gmra.mxu1 %vm365_vm1, %v1578_v16  ;;  %v991_v30 = vsel %vm961_vm5, %v928_v3, %v929_v19  ;;  %v1580_v3 = vsel %vm237_vm14, 1.0, %v1842_v24 }
 0x115   :  { %1677 = vmatmul.msk.f32.gmra.mxu2 %vm365_vm1, %v1578_v16  ;;  %1710 = vmatmul.msk.f32.gmra.mxu3 %vm365_vm1, %v1578_v16  ;;  %v995_v39 = vadd.f32 %v991_v30, %v495_v0  ;;  %v189_v30 = vpop.permute.xlu1 %188 }
 0x116   :  { %v1188_v27 = vadd.f32 %v1186_v26, %v1091_v20  ;;  %vm239_vm0 = vcmp.eq.s32.totalorder %v1985_v22, %v189_v30 }
 0x118   :  { %v724_v32 = vpop.f32.mrf.mxu2  ;;  %v837_v33 = vpop.f32.mrf.mxu3  ;;  %v1224_v45 = vadd.f32 %v2153_v31, %v1188_v27 }
 0x119   :  { %v1028_v34 = vrot.slane %v724_v32, 2  ;;  %v1125_v35 = vrot.slane %v837_v33, 3  ;;  %v501_v36 = vpop.f32.mrf.mxu0  ;;  %v614_v37 = vpop.f32.mrf.mxu1 }
 0x11a   :  { %v930_v44 = vrot.slane %v614_v37, 1  ;;  %v1256_v50 = vmax.f32 %v1224_v45, 0.0 }
 0x11b   :  { %v1088_v42 = vsel %vm1058_vm7, %v1027_v10, %v1028_v34  ;;  %v1185_v43 = vsel %vm1155_vm9, %v1124_v11, %v1125_v35 }
 0x11c   :  { %v1092_v46 = vadd.f32 %v1088_v42, %v995_v39  ;;  %1612 = vmatmul.msk.f32.gmra.mxu0 %vm365_vm1, %v1579_v41  ;;  %1645 = vmatmul.msk.f32.gmra.mxu1 %vm365_vm1, %v1579_v41  ;;  %v990_v49 = vsel %vm961_vm5, %v929_v19, %v930_v44  ;;  %v1301_v8 = vmul.f32 %v2171_v54, %v1256_v50 }
 0x11d   :  { %1678 = vmatmul.msk.f32.gmra.mxu2 %vm365_vm1, %v1579_v41  ;;  %1711 = vmatmul.msk.f32.gmra.mxu3 %vm365_vm1, %v1579_v41  ;;  %v996_v1 = vadd.f32 %v990_v49, %v2128_v12  ;;  %v186_v12 = vpop.permute.xlu0 %185  ;;  %v1458_v41 = vld [vmem:[%s2122_s25 + $0x68] sm:$0xff] }
 0x11e   :  { %v1189_v47 = vadd.f32 %v1185_v43, %v1092_v46  ;;  %vm238_vm15 = vcmp.eq.s32.totalorder %v1985_v22, %v186_v12  ;;  %1506 = vmatpush.msrb.mxu0 %v1458_v41  ;;  %1729 = vmatpush.msrb.mxu1 %v1458_v41  ;;  %v1582_v46 = vsel %vm239_vm0, 1.0, %v1842_v24 }
 0x11f   :  { %v1581_v26 = vsel %vm238_vm15, 1.0, %v1842_v24 }
 0x120   :  { %v1225_v51 = vadd.f32 %v2153_v31, %v1189_v47  ;;  %v727_v52 = vpop.f32.mrf.mxu2  ;;  %v840_v53 = vpop.f32.mrf.mxu3 }
 0x121   :  { %v1029_v56 = vrot.slane %v727_v52, 2  ;;  %v1126_v57 = vrot.slane %v840_v53, 3  ;;  %v504_v59 = vpop.f32.mrf.mxu0  ;;  %v617_v60 = vpop.f32.mrf.mxu1 }
 0x122   :  { %v1257_v0 = vmax.f32 %v1225_v51, 0.0  ;;  %v931_v7 = vrot.slane %v617_v60, 1  ;;  %v192_v53 = vpop.permute.xlu2 %191 }
 0x123   :  { %v1087_v4 = vsel %vm1058_vm7, %v1028_v34, %v1029_v56  ;;  %v1184_v6 = vsel %vm1155_vm9, %v1125_v35, %v1126_v57  ;;  %vm240_vm2 = vcmp.eq.s32.totalorder %v1985_v22, %v192_v53  ;;  %v198_v53 = vpop.permute.xlu1 %197 }
 0x124   :  { %v1302_v10 = vmul.f32 %v2174_v55, %v1257_v0  ;;  %v1093_v11 = vadd.f32 %v1087_v4, %v996_v1  ;;  %1613 = vmatmul.msk.f32.gmra.mxu0 %vm365_vm1, %v1580_v3  ;;  %1646 = vmatmul.msk.f32.gmra.mxu1 %vm365_vm1, %v1580_v3  ;;  %v989_v15 = vsel %vm961_vm5, %v930_v44, %v931_v7  ;;  %v1583_v12 = vsel %vm240_vm2, 1.0, %v1842_v24 }
 0x125   :  { %1679 = vmatmul.msk.f32.gmra.mxu2 %vm365_vm1, %v1580_v3  ;;  %1712 = vmatmul.msk.f32.gmra.mxu3 %vm365_vm1, %v1580_v3  ;;  %v997_v25 = vadd.f32 %v989_v15, %v501_v36  ;;  %vm242_vm6 = vcmp.eq.s32.totalorder %v1985_v22, %v198_v53  ;;  %vm1489_vm2 = vcmask 1045509  }
 0x126   :  { %v1333_v13 = vmax.f32 %v1301_v8, %v1302_v10  ;;  %v1190_v14 = vadd.f32 %v1184_v6, %v1093_v11 }
 0x128   :  { %v730_v16 = vpop.f32.mrf.mxu2  ;;  %v843_v18 = vpop.f32.mrf.mxu3  ;;  %v1226_v32 = vadd.f32 %v2153_v31, %v1190_v14  ;;  %v1334_v35 = vrot.slane %v1333_v13, 4 }
 0x129   :  { %v1030_v19 = vrot.slane %v730_v16, 2  ;;  %v1127_v20 = vrot.slane %v843_v18, 3  ;;  %v507_v21 = vpop.f32.mrf.mxu0  ;;  %v620_v23 = vpop.f32.mrf.mxu1 }
 0x12a   :  { %v932_v29 = vrot.slane %v620_v23, 1  ;;  %v1258_v37 = vmax.f32 %v1226_v32, 0.0  ;;  %v1335_v49 = vmax.f32 %v1333_v13, %v1334_v35  ;;  %v195_v16 = vpop.permute.xlu0 %194 }
 0x12b   :  { %v1086_v27 = vsel %vm1058_vm7, %v1029_v56, %v1030_v19  ;;  %v1183_v28 = vsel %vm1155_vm9, %v1126_v57, %v1127_v20  ;;  %vm241_vm3 = vcmp.eq.s32.totalorder %v1985_v22, %v195_v16 }
 0x12c   :  { %v1094_v33 = vadd.f32 %v1086_v27, %v997_v25  ;;  %1614 = vmatmul.msk.f32.gmra.mxu0 %vm365_vm1, %v1581_v26  ;;  %1647 = vmatmul.msk.f32.gmra.mxu1 %vm365_vm1, %v1581_v26  ;;  %v988_v36 = vsel %vm961_vm5, %v931_v7, %v932_v29  ;;  %v1303_v56 = vmul.f32 %v2171_v54, %v1258_v37  ;;  %v1336_v1 = vrot.slane %v1335_v49, 2  ;;  %v1457_v37 = vld [vmem:[%s2122_s25 + $0x60] sm:$0xff] }
 0x12d   :  { %1680 = vmatmul.msk.f32.gmra.mxu2 %vm365_vm1, %v1581_v26  ;;  %1713 = vmatmul.msk.f32.gmra.mxu3 %vm365_vm1, %v1581_v26  ;;  %v998_v48 = vadd.f32 %v988_v36, %v504_v59 }
 0x12e   :  { %v1191_v34 = vadd.f32 %v1183_v28, %v1094_v33  ;;  %v1337_v18 = vmax.f32 %v1335_v49, %v1336_v1  ;;  %1507 = vmatpush.msrb.mxu0 %v1457_v37  ;;  %1730 = vmatpush.msrb.mxu1 %v1457_v37 }
 0x130   :  { %v1227_v38 = vadd.f32 %v2153_v31, %v1191_v34  ;;  %v733_v39 = vpop.f32.mrf.mxu2  ;;  %v846_v40 = vpop.f32.mrf.mxu3  ;;  %v1338_v30 = vrot.slane %v1337_v18, 1 }
 0x131   :  { %v1031_v42 = vrot.slane %v733_v39, 2  ;;  %v1128_v43 = vrot.slane %v846_v40, 3  ;;  %v510_v44 = vpop.f32.mrf.mxu0  ;;  %v623_v45 = vpop.f32.mrf.mxu1 }
 0x132   :  { %v1259_v47 = vmax.f32 %v1227_v38, 0.0  ;;  %v933_v52 = vrot.slane %v623_v45, 1  ;;  %v1584_v38 = vsel %vm241_vm3, 1.0, %v1842_v24  ;;  %vm1491_vm3 = vcmask 1046534  }
 0x133   :  { %v1085_v50 = vsel %vm1058_vm7, %v1030_v19, %v1031_v42  ;;  %v1182_v51 = vsel %vm1155_vm9, %v1127_v20, %v1128_v43 }
 0x134   :  { %v1304_v57 = vmul.f32 %v2174_v55, %v1259_v47  ;;  %v1095_v60 = vadd.f32 %v1085_v50, %v998_v48  ;;  %1615 = vmatmul.msk.f32.gmra.mxu0 %vm365_vm1, %v1582_v46  ;;  %1648 = vmatmul.msk.f32.gmra.mxu1 %vm365_vm1, %v1582_v46  ;;  %v987_v2 = vsel %vm961_vm5, %v932_v29, %v933_v52 }
 0x135   :  { %1681 = vmatmul.msk.f32.gmra.mxu2 %vm365_vm1, %v1582_v46  ;;  %1714 = vmatmul.msk.f32.gmra.mxu3 %vm365_vm1, %v1582_v46  ;;  %v999_v14 = vadd.f32 %v987_v2, %v507_v21  ;;  %v1339_v46 = vmax.f32 %v1337_v18, %v1338_v30 }
 0x136   :  { %v1340_v59 = vmax.f32 %v1303_v56, %v1304_v57  ;;  %v1192_v0 = vadd.f32 %v1182_v51, %v1095_v60 }
 0x138   :  { %v1341_v3 = vrot.slane %v1340_v59, 4  ;;  %v736_v4 = vpop.f32.mrf.mxu2  ;;  %v849_v6 = vpop.f32.mrf.mxu3  ;;  %v1228_v19 = vadd.f32 %v2153_v31, %v1192_v0 }
 0x139   :  { %v1032_v7 = vrot.slane %v736_v4, 2  ;;  %v1129_v8 = vrot.slane %v849_v6, 3  ;;  %v513_v10 = vpop.f32.mrf.mxu0  ;;  %v626_v11 = vpop.f32.mrf.mxu1 }
 0x13a   :  { %v1342_v13 = vmax.f32 %v1340_v59, %v1341_v3  ;;  %v934_v15 = vrot.slane %v626_v11, 1  ;;  %v1260_v32 = vmax.f32 %v1228_v19, 0.0 }
 0x13b   :  { %v1084_v20 = vsel %vm1058_vm7, %v1031_v42, %v1032_v7  ;;  %v1181_v23 = vsel %vm1155_vm9, %v1128_v43, %v1129_v8 }
 0x13c   :  { %v1343_v25 = vrot.slane %v1342_v13, 2  ;;  %v1096_v26 = vadd.f32 %v1084_v20, %v999_v14  ;;  %v986_v27 = vsel %vm961_vm5, %v933_v52, %v934_v15  ;;  %1616 = vmatmul.msk.f32.gmra.mxu0 %vm365_vm1, %v1583_v12  ;;  %1649 = vmatmul.msk.f32.gmra.mxu1 %vm365_vm1, %v1583_v12  ;;  %v1305_v47 = vmul.f32 %v2171_v54, %v1260_v32  ;;  %v1456_v20 = vld [vmem:[%s2122_s25 + $0x58] sm:$0xff] }
 0x13d   :  { %v1000_v21 = vadd.f32 %v986_v27, %v510_v44  ;;  %1682 = vmatmul.msk.f32.gmra.mxu2 %vm365_vm1, %v1583_v12  ;;  %1715 = vmatmul.msk.f32.gmra.mxu3 %vm365_vm1, %v1583_v12 }
 0x13e   :  { %v1344_v28 = vmax.f32 %v1342_v13, %v1343_v25  ;;  %v1193_v29 = vadd.f32 %v1181_v23, %v1096_v26  ;;  %1508 = vmatpush.msrb.mxu0 %v1456_v20  ;;  %1731 = vmatpush.msrb.mxu1 %v1456_v20 }
 0x140   :  { %v1345_v33 = vrot.slane %v1344_v28, 1  ;;  %v1229_v34 = vadd.f32 %v2153_v31, %v1193_v29  ;;  %v739_v35 = vpop.f32.mrf.mxu2  ;;  %v852_v36 = vpop.f32.mrf.mxu3 }
 0x141   :  { %v1033_v39 = vrot.slane %v739_v35, 2  ;;  %v1130_v40 = vrot.slane %v852_v36, 3  ;;  %v2237_v41 = vpop.f32.mrf.mxu0  ;;  %v2239_v42 = vpop.f32.mrf.mxu1 }
 0x142   :  { %v1346_v43 = vmax.f32 %v1344_v28, %v1345_v33  ;;  %v1261_v44 = vmax.f32 %v1229_v34, 0.0  ;;  %v935_v45 = vrot.slane %v2239_v42, 1  ;;  %v204_v36 = vpop.permute.xlu0 %203 }
 0x143   :  { %v1083_v48 = vsel %vm1058_vm7, %v1032_v7, %v1033_v39  ;;  %v1180_v49 = vsel %vm1155_vm9, %v1129_v8, %v1130_v40  ;;  %vm244_vm11 = vcmp.eq.s32.totalorder %v1985_v22, %v204_v36 }
 0x144   :  { %v1306_v50 = vmul.f32 %v2174_v55, %v1261_v44  ;;  %v1097_v51 = vadd.f32 %v1083_v48, %v1000_v21  ;;  %v985_v52 = vsel %vm961_vm5, %v934_v15, %v935_v45  ;;  %1617 = vmatmul.msk.f32.gmra.mxu0 %vm365_vm1, %v1584_v38  ;;  %1650 = vmatmul.msk.f32.gmra.mxu1 %vm365_vm1, %v1584_v38  ;;  %v201_v15 = vpop.permute.xlu2 %200  ;;  %v1455_v48 = vld [vmem:[%s2122_s25 + $0x50] sm:$0xff] }
 0x145   :  { %v1001_v56 = vadd.f32 %v985_v52, %v513_v10  ;;  %1683 = vmatmul.msk.f32.gmra.mxu2 %vm365_vm1, %v1584_v38  ;;  %1716 = vmatmul.msk.f32.gmra.mxu3 %vm365_vm1, %v1584_v38  ;;  %v1482_v57 = vsel %vm1481_vm4, %v1346_v43, %v1339_v46  ;;  %v1585_v10 = vsel %vm242_vm6, 1.0, %v1842_v24  ;;  %vm243_vm8 = vcmp.eq.s32.totalorder %v1985_v22, %v201_v15 }
 0x146   :  { %v1347_v60 = vmax.f32 %v1305_v47, %v1306_v50  ;;  %v1194_v59 = vadd.f32 %v1180_v49, %v1097_v51  ;;  %v1586_v33 = vsel %vm243_vm8, 1.0, %v1842_v24  ;;  %v1587_v49 = vsel %vm244_vm11, 1.0, %v1842_v24  ;;  %1509 = vmatpush.msrb.mxu0 %v1455_v48  ;;  %1732 = vmatpush.msrb.mxu1 %v1455_v48  ;;  %v207_v51 = vpop.permute.xlu1 %206 }
 0x147   :  { %vm245_vm12 = vcmp.eq.s32.totalorder %v1985_v22, %v207_v51  ;;  %vm1493_vm6 = vcmask 1047559  }
 0x148   :  { %v1348_v0 = vrot.slane %v1347_v60, 4  ;;  %v2258_v1 = vpop.f32.mrf.mxu2  ;;  %v2260_v2 = vpop.f32.mrf.mxu3  ;;  %v1230_v13 = vadd.f32 %v2153_v31, %v1194_v59 }
 0x149   :  { %v1034_v3 = vrot.slane %v2258_v1, 2  ;;  %v1131_v4 = vrot.slane %v2260_v2, 3  ;;  %v2264_v6 = vpop.f32.mrf.mxu0  ;;  %v2266_v7 = vpop.f32.mrf.mxu1 }
 0x14a   :  { %v1349_v8 = vmax.f32 %v1347_v60, %v1348_v0  ;;  %v1262_v25 = vmax.f32 %v1230_v13, 0.0 }
 0x14b   :  { %v1082_v11 = vsel %vm1058_vm7, %v1033_v39, %v1034_v3  ;;  %v1179_v16 = vsel %vm1155_vm9, %v1130_v40, %v1131_v4 }
 0x14c   :  { %v1350_v12 = vrot.slane %v1349_v8, 2  ;;  %v1098_v14 = vadd.f32 %v1082_v11, %v1001_v56  ;;  %1618 = vmatmul.msk.f32.gmra.mxu0 %vm365_vm1, %v1585_v10  ;;  %1651 = vmatmul.msk.f32.gmra.mxu1 %vm365_vm1, %v1585_v10  ;;  %v1307_v34 = vmul.f32 %v2171_v54, %v1262_v25 }
 0x14d   :  { %1684 = vmatmul.msk.f32.gmra.mxu2 %vm365_vm1, %v1585_v10  ;;  %1717 = vmatmul.msk.f32.gmra.mxu3 %vm365_vm1, %v1585_v10  ;;  %v210_v10 = vpop.permute.xlu2 %209 }
 0x14e   :  { %v1351_v18 = vmax.f32 %v1349_v8, %v1350_v12  ;;  %v1195_v19 = vadd.f32 %v1179_v16, %v1098_v14  ;;  %v1588_v8 = vsel %vm245_vm12, 1.0, %v1842_v24  ;;  %vm246_vm14 = vcmp.eq.s32.totalorder %v1985_v22, %v210_v10  ;;  %v213_v12 = vpop.permute.xlu0 %212  ;;  %v1454_v16 = vld [vmem:[%s2122_s25 + $0x48] sm:$0xff] }
 0x14f   :  { %1510 = vmatpush.msrb.mxu0 %v1454_v16  ;;  %1733 = vmatpush.msrb.mxu1 %v1454_v16  ;;  %v1589_v25 = vsel %vm246_vm14, 1.0, %v1842_v24  ;;  %vm247_vm15 = vcmp.eq.s32.totalorder %v1985_v22, %v213_v12  ;;  %v1453_v12 = vld [vmem:[%s2122_s25 + $0x40] sm:$0xff]  ;;  %v1452_v16 = vld [vmem:[%s2122_s25 + $0x38] sm:$0xff] }
 0x150   :  { %v1352_v23 = vrot.slane %v1351_v18, 1  ;;  %v1231_v26 = vadd.f32 %v2153_v31, %v1195_v19  ;;  %v2285_v27 = vpop.f32.mrf.mxu2  ;;  %v2287_v21 = vpop.f32.mrf.mxu3  ;;  %v1590_v36 = vsel %vm247_vm15, 1.0, %v1842_v24 }
 0x151   :  { %v2289_v28 = vpop.f32.mrf.mxu0  ;;  %v2291_v29 = vpop.f32.mrf.mxu1  ;;  %1511 = vmatpush.msrb.mxu0 %v1453_v12  ;;  %1734 = vmatpush.msrb.mxu1 %v1453_v12 }
 0x152   :  { %v1263_v30 = vmax.f32 %v1231_v26, 0.0  ;;  %v1353_v32 = vmax.f32 %v1351_v18, %v1352_v23  ;;  %v937_v13 = vrot.slane %v2291_v29, 1  ;;  %v936_v18 = vrot.slane %v2266_v7, 1 }
 0x153   :  { %v1035_v29 = vrot.slane %v2285_v27, 2  ;;  %1512 = vmatpush.msrb.mxu0 %v1452_v16  ;;  %1735 = vmatpush.msrb.mxu1 %v1452_v16  ;;  %v1446_v16 = vld [vmem:[%s2122_s25 + $0x8] sm:$0xff] }
 0x154   :  { %v1308_v35 = vmul.f32 %v2174_v55, %v1263_v30  ;;  %1619 = vmatmul.msk.f32.gmra.mxu0 %vm365_vm1, %v1586_v33  ;;  %1652 = vmatmul.msk.f32.gmra.mxu1 %vm365_vm1, %v1586_v33  ;;  %v1484_v37 = vsel %vm1483_vm10, %v1353_v32, %v1482_v57  ;;  %v983_v7 = vsel %vm961_vm5, %v936_v18, %v937_v13 }
 0x155   :  { %1685 = vmatmul.msk.f32.gmra.mxu2 %vm365_vm1, %v1586_v33  ;;  %1718 = vmatmul.msk.f32.gmra.mxu3 %vm365_vm1, %v1586_v33  ;;  %v1081_v42 = vsel %vm1058_vm7, %v1034_v3, %v1035_v29 }
 0x156   :  { %v1354_v38 = vmax.f32 %v1307_v34, %v1308_v35  ;;  %v984_v34 = vsel %vm961_vm5, %v935_v45, %v936_v18  ;;  %v1003_v45 = vadd.f32 %v983_v7, %v2264_v6 }
 0x158   :  { %v1355_v39 = vrot.slane %v1354_v38, 4  ;;  %v2302_v40 = vpop.f32.mrf.mxu2  ;;  %v2304_v43 = vpop.f32.mrf.mxu3 }
 0x159   :  { %v2306_v44 = vpop.f32.mrf.mxu0  ;;  %v638_v46 = vpop.f32.mrf.mxu1  ;;  %v1036_v26 = vrot.slane %v2302_v40, 2  ;;  %v1002_v40 = vadd.f32 %v984_v34, %v2237_v41 }
 0x15a   :  { %v1356_v47 = vmax.f32 %v1354_v38, %v1355_v39  ;;  %v938_v30 = vrot.slane %v638_v46, 1  ;;  %v1133_v46 = vrot.slane %v2304_v43, 3 }
 0x15b   :  { %v1099_v43 = vadd.f32 %v1081_v42, %v1002_v40 }
 0x15c   :  { %v1357_v50 = vrot.slane %v1356_v47, 2  ;;  %1620 = vmatmul.msk.f32.gmra.mxu0 %vm365_vm1, %v1587_v49  ;;  %1653 = vmatmul.msk.f32.gmra.mxu1 %vm365_vm1, %v1587_v49  ;;  %v982_v38 = vsel %vm961_vm5, %v937_v13, %v938_v30 }
 0x15d   :  { %1686 = vmatmul.msk.f32.gmra.mxu2 %vm365_vm1, %v1587_v49  ;;  %1719 = vmatmul.msk.f32.gmra.mxu3 %vm365_vm1, %v1587_v49 }
 0x15e   :  { %v1358_v52 = vmax.f32 %v1356_v47, %v1357_v50 }
 0x160   :  { %v1359_v53 = vrot.slane %v1358_v52, 1  ;;  %v751_v56 = vpop.f32.mrf.mxu2  ;;  %v2315_v57 = vpop.f32.mrf.mxu3 }
 0x161   :  { %v528_v60 = vpop.f32.mrf.mxu0  ;;  %v641_v59 = vpop.f32.mrf.mxu1  ;;  %v1037_v35 = vrot.slane %v751_v56, 2 }
 0x162   :  { %v1360_v0 = vmax.f32 %v1358_v52, %v1359_v53  ;;  %v939_v19 = vrot.slane %v641_v59, 1  ;;  %v1004_v53 = vadd.f32 %v982_v38, %v2289_v28  ;;  %v1134_v59 = vrot.slane %v2315_v57, 3 }
 0x163   :  { %v1079_v49 = vsel %vm1058_vm7, %v1036_v26, %v1037_v35 }
 0x164   :  { %1621 = vmatmul.msk.f32.gmra.mxu0 %vm365_vm1, %v1588_v8  ;;  %1654 = vmatmul.msk.f32.gmra.mxu1 %vm365_vm1, %v1588_v8  ;;  %v2323_v11 = vsel %vm1485_vm13, %v1360_v0, %v1484_v37  ;;  %v981_v27 = vsel %vm961_vm5, %v938_v30, %v939_v19  ;;  %v1080_v37 = vsel %vm1058_vm7, %v1035_v29, %v1036_v26  ;;  %v1451_v29 = vld [vmem:[%s2122_s25 + $0x30] sm:$0xff] }
 0x165   :  { %1687 = vmatmul.msk.f32.gmra.mxu2 %vm365_vm1, %v1588_v8  ;;  %1720 = vmatmul.msk.f32.gmra.mxu3 %vm365_vm1, %v1588_v8  ;;  %v1005_v47 = vadd.f32 %v981_v27, %v2306_v44  ;;  %v1100_v6 = vadd.f32 %v1080_v37, %v1003_v45  ;;  %v1132_v44 = vrot.slane %v2287_v21, 3  ;;  %v216_v21 = vpop.permute.xlu1 %215 }
 0x166   :  { %vm248_vm0 = vcmp.eq.s32.totalorder %v1985_v22, %v216_v21  ;;  %1513 = vmatpush.msrb.mxu0 %v1451_v29  ;;  %1736 = vmatpush.msrb.mxu1 %v1451_v29 }
 0x167   :  { %v1177_v13 = vsel %vm1155_vm9, %v1132_v44, %v1133_v46  ;;  %v1178_v18 = vsel %vm1155_vm9, %v1131_v4, %v1132_v44  ;;  %v1591_v45 = vsel %vm248_vm0, 1.0, %v1842_v24 }
 0x168   :  { %v754_v14 = vpop.f32.mrf.mxu2  ;;  %v2327_v15 = vpop.f32.mrf.mxu3  ;;  %v1197_v28 = vadd.f32 %v1177_v13, %v1100_v6  ;;  %v1447_v13 = vld [vmem:[%s2122_s25 + $0x10] sm:$0xff] }
 0x169   :  { %v2331_v20 = vpop.f32.mrf.mxu0  ;;  %v2333_v23 = vpop.f32.mrf.mxu1  ;;  %v1038_v32 = vrot.slane %v754_v14, 2  ;;  %v1135_v50 = vrot.slane %v2327_v15, 3  ;;  %v1101_v14 = vadd.f32 %v1079_v49, %v1004_v53 }
 0x16a   :  { %v940_v33 = vrot.slane %v2333_v23, 1  ;;  %v1196_v23 = vadd.f32 %v1178_v18, %v1099_v43  ;;  %v1233_v4 = vadd.f32 %v2153_v31, %v1197_v28 }
 0x16b   :  { %v1078_v39 = vsel %vm1058_vm7, %v1037_v35, %v1038_v32  ;;  %v1175_v57 = vsel %vm1155_vm9, %v1134_v59, %v1135_v50 }
 0x16c   :  { %1622 = vmatmul.msk.f32.gmra.mxu0 %vm365_vm1, %v1589_v25  ;;  %1655 = vmatmul.msk.f32.gmra.mxu1 %vm365_vm1, %v1589_v25  ;;  %v980_v1 = vsel %vm961_vm5, %v939_v19, %v940_v33  ;;  %v1102_v56 = vadd.f32 %v1078_v39, %v1005_v47  ;;  %v1232_v38 = vadd.f32 %v2153_v31, %v1196_v23 }
 0x16d   :  { %1688 = vmatmul.msk.f32.gmra.mxu2 %vm365_vm1, %v1589_v25  ;;  %1721 = vmatmul.msk.f32.gmra.mxu3 %vm365_vm1, %v1589_v25  ;;  %v1006_v0 = vadd.f32 %v980_v1, %v528_v60  ;;  %v1176_v25 = vsel %vm1155_vm9, %v1133_v46, %v1134_v59  ;;  %v1450_v46 = vld [vmem:[%s2122_s25 + $0x28] sm:$0xff] }
 0x16e   :  { %v1199_v19 = vadd.f32 %v1175_v57, %v1102_v56  ;;  %v1198_v30 = vadd.f32 %v1176_v25, %v1101_v14  ;;  %1514 = vmatpush.msrb.mxu0 %v1450_v46  ;;  %1737 = vmatpush.msrb.mxu1 %v1450_v46  ;;  %v1264_v49 = vmax.f32 %v1232_v38, 0.0 }
 0x170   :  { %v757_v48 = vpop.f32.mrf.mxu2  ;;  %v2369_v3 = vpop.f32.mrf.mxu3  ;;  %v1235_v37 = vadd.f32 %v2153_v31, %v1199_v19  ;;  %v1234_v47 = vadd.f32 %v2153_v31, %v1198_v30  ;;  %v1309_v21 = vmul.f32 %v2171_v54, %v1264_v49 }
 0x171   :  { %v1039_v51 = vrot.slane %v757_v48, 2  ;;  %v2374_v52 = vpop.f32.mrf.mxu0  ;;  %v2376_v41 = vpop.f32.mrf.mxu1  ;;  %v1136_v15 = vrot.slane %v2369_v3, 3  ;;  %v1449_v48 = vld [vmem:[%s2122_s25 + $0x20] sm:$0xff] }
 0x172   :  { %v941_v10 = vrot.slane %v2376_v41, 1  ;;  %v1267_v3 = vmax.f32 %v1235_v37, 0.0  ;;  %v1266_v41 = vmax.f32 %v1234_v47, 0.0  ;;  %1515 = vmatpush.msrb.mxu0 %v1449_v48  ;;  %1738 = vmatpush.msrb.mxu1 %v1449_v48 }
 0x173   :  { %v1077_v8 = vsel %vm1058_vm7, %v1038_v32, %v1039_v51  ;;  %v1174_v2 = vsel %vm1155_vm9, %v1135_v50, %v1136_v15 }
 0x174   :  { %1623 = vmatmul.msk.f32.gmra.mxu0 %vm365_vm1, %v1590_v36  ;;  %1656 = vmatmul.msk.f32.gmra.mxu1 %vm365_vm1, %v1590_v36  ;;  %v1103_v60 = vadd.f32 %v1077_v8, %v1006_v0  ;;  %v979_v26 = vsel %vm961_vm5, %v940_v33, %v941_v10  ;;  %v1312_v14 = vmul.f32 %v2174_v55, %v1267_v3 }
 0x175   :  { %1689 = vmatmul.msk.f32.gmra.mxu2 %vm365_vm1, %v1590_v36  ;;  %1722 = vmatmul.msk.f32.gmra.mxu3 %vm365_vm1, %v1590_v36  ;;  %v1007_v42 = vadd.f32 %v979_v26, %v2331_v20  ;;  %v1265_v20 = vmax.f32 %v1233_v4, 0.0  ;;  %v1311_v18 = vmul.f32 %v2171_v54, %v1266_v41 }
 0x176   :  { %v1200_v34 = vadd.f32 %v1174_v2, %v1103_v60 }
 0x177   :  { %v1310_v56 = vmul.f32 %v2174_v55, %v1265_v20  ;;  %v1368_v29 = vmax.f32 %v1311_v18, %v1312_v14 }
 0x178   :  { %v760_v32 = vpop.f32.mrf.mxu2  ;;  %v2407_v7 = vpop.f32.mrf.mxu3  ;;  %v1236_v22 = vadd.f32 %v2153_v31, %v1200_v34 }
 0x179   :  { %v1040_v35 = vrot.slane %v760_v32, 2  ;;  %v1137_v27 = vrot.slane %v2407_v7, 3  ;;  %v2411_v33 = vpop.f32.mrf.mxu0  ;;  %v2413_v36 = vpop.f32.mrf.mxu1  ;;  %v1361_v25 = vmax.f32 %v1309_v21, %v1310_v56 }
 0x17a   :  { %v942_v40 = vrot.slane %v2413_v36, 1  ;;  %v1268_v59 = vmax.f32 %v1236_v22, 0.0 }
 0x17b   :  { %v1076_v39 = vsel %vm1058_vm7, %v1039_v51, %v1040_v35  ;;  %v1173_v24 = vsel %vm1155_vm9, %v1136_v15, %v1137_v27  ;;  %v1448_v51 = vld [vmem:[%s2122_s25 + $0x18] sm:$0xff]  ;;  %v1362_v36 = vrot.slane %v1361_v25, 4 }
 0x17c   :  { %v1104_v1 = vadd.f32 %v1076_v39, %v1007_v42  ;;  %1624 = vmatmul.msk.f32.gmra.mxu0 %vm365_vm1, %v1591_v45  ;;  %1657 = vmatmul.msk.f32.gmra.mxu1 %vm365_vm1, %v1591_v45  ;;  %v978_v50 = vsel %vm961_vm5, %v941_v10, %v942_v40  ;;  %v1313_v26 = vmul.f32 %v2171_v54, %v1268_v59  ;;  %v1369_v39 = vrot.slane %v1368_v29, 4 }
 0x17d   :  { %1690 = vmatmul.msk.f32.gmra.mxu2 %vm365_vm1, %v1591_v45  ;;  %1723 = vmatmul.msk.f32.gmra.mxu3 %vm365_vm1, %v1591_v45  ;;  %v1008_v15 = vadd.f32 %v978_v50, %v2374_v52  ;;  %v1445_v52 = vld [vmem:[%s2122_s25] sm:$0xff]  ;;  %v1363_v22 = vmax.f32 %v1361_v25, %v1362_v36  ;;  %vm1487_vm1 = vcmask 1044484  }
 0x17e   :  { %v1201_v6 = vadd.f32 %v1173_v24, %v1104_v1  ;;  %1516 = vmatpush.msrb.mxu0 %v1448_v51  ;;  %1739 = vmatpush.msrb.mxu1 %v1448_v51  ;;  %v1370_v3 = vmax.f32 %v1368_v29, %v1369_v39 }
 0x180   :  { %v1237_v43 = vadd.f32 %v2153_v31, %v1201_v6  ;;  %v763_v44 = vpop.f32.mrf.mxu2  ;;  %v876_v53 = vpop.f32.mrf.mxu3  ;;  %1517 = vmatpush.msrb.mxu0 %v1447_v13  ;;  %1740 = vmatpush.msrb.mxu1 %v1447_v13  ;;  %v1371_v13 = vrot.slane %v1370_v3, 2 }
 0x181   :  { %v1041_v0 = vrot.slane %v763_v44, 2  ;;  %v540_v8 = vpop.f32.mrf.mxu0  ;;  %v653_v12 = vpop.f32.mrf.mxu1  ;;  %v1138_v57 = vrot.slane %v876_v53, 3 }
 0x182   :  { %v1269_v10 = vmax.f32 %v1237_v43, 0.0  ;;  %v943_v60 = vrot.slane %v653_v12, 1  ;;  %1518 = vmatpush.msrb.mxu0 %v1446_v16  ;;  %1741 = vmatpush.msrb.mxu1 %v1446_v16  ;;  %v1364_v43 = vrot.slane %v1363_v22, 2 }
 0x183   :  { %v1075_v28 = vsel %vm1058_vm7, %v1040_v35, %v1041_v0  ;;  %v1172_v2 = vsel %vm1155_vm9, %v1137_v27, %v1138_v57 }
 0x184   :  { %v1314_v19 = vmul.f32 %v2174_v55, %v1269_v10  ;;  %v1105_v23 = vadd.f32 %v1075_v28, %v1008_v15  ;;  %v977_v32 = vsel %vm961_vm5, %v942_v40, %v943_v60  ;;  %1519 = vmatpush.msrb.mxu0 %v1445_v52  ;;  %1742 = vmatpush.msrb.mxu1 %v1445_v52 }
 0x185   :  { %v1009_v7 = vadd.f32 %v977_v32, %v2411_v33 }
 0x186   :  { %v1375_v30 = vmax.f32 %v1313_v26, %v1314_v19  ;;  %v1202_v4 = vadd.f32 %v1172_v2, %v1105_v23  ;;  %v1372_v23 = vmax.f32 %v1370_v3, %v1371_v13 }
 0x188   :  { %v766_v34 = vpop.f32.mrf.mxu2  ;;  %v879_v35 = vpop.f32.mrf.mxu3  ;;  %v1376_v47 = vrot.slane %v1375_v30, 4  ;;  %v1238_v40 = vadd.f32 %v2153_v31, %v1202_v4  ;;  %v1373_v36 = vrot.slane %v1372_v23, 1 }
 0x189   :  { %v1042_v37 = vrot.slane %v766_v34, 2  ;;  %v1139_v42 = vrot.slane %v879_v35, 3  ;;  %v543_v45 = vpop.f32.mrf.mxu0  ;;  %v656_v38 = vpop.f32.mrf.mxu1 }
 0x18a   :  { %v944_v46 = vrot.slane %v656_v38, 1  ;;  %v1377_v49 = vmax.f32 %v1375_v30, %v1376_v47  ;;  %v1270_v33 = vmax.f32 %v1238_v40, 0.0 }
 0x18b   :  { %v1074_v27 = vsel %vm1058_vm7, %v1041_v0, %v1042_v37  ;;  %v1171_v24 = vsel %vm1155_vm9, %v1138_v57, %v1139_v42 }
 0x18c   :  { %v1106_v1 = vadd.f32 %v1074_v27, %v1009_v7  ;;  %v976_v20 = vsel %vm961_vm5, %v943_v60, %v944_v46  ;;  %v1378_v10 = vrot.slane %v1377_v49, 2  ;;  %v1315_v15 = vmul.f32 %v2171_v54, %v1270_v33 }
 0x18d   :  { %v1010_v48 = vadd.f32 %v976_v20, %v540_v8  ;;  %v1365_v60 = vmax.f32 %v1363_v22, %v1364_v43  ;;  %v1374_v20 = vmax.f32 %v1372_v23, %v1373_v36 }
 0x18e   :  { %v1203_v6 = vadd.f32 %v1171_v24, %v1106_v1  ;;  %v1379_v25 = vmax.f32 %v1377_v49, %v1378_v10 }
 0x18f   :  { %v1366_v34 = vrot.slane %v1365_v60, 1 }
 0x190   :  { %v1239_v50 = vadd.f32 %v2153_v31, %v1203_v6  ;;  %v769_v51 = vpop.f32.mrf.mxu2  ;;  %v882_v41 = vpop.f32.mrf.mxu3  ;;  %v1380_v39 = vrot.slane %v1379_v25, 1 }
 0x191   :  { %v1043_v44 = vrot.slane %v769_v51, 2  ;;  %v1140_v53 = vrot.slane %v882_v41, 3  ;;  %v546_v56 = vpop.f32.mrf.mxu0  ;;  %v659_v59 = vpop.f32.mrf.mxu1  ;;  %v1367_v40 = vmax.f32 %v1365_v60, %v1366_v34 }
 0x192   :  { %v1271_v0 = vmax.f32 %v1239_v50, 0.0  ;;  %v945_v12 = vrot.slane %v659_v59, 1 }
 0x193   :  { %v1073_v14 = vsel %vm1058_vm7, %v1042_v37, %v1043_v44  ;;  %v1170_v8 = vsel %vm1155_vm9, %v1139_v42, %v1140_v53 }
 0x194   :  { %v1316_v21 = vmul.f32 %v2174_v55, %v1271_v0  ;;  %v1107_v28 = vadd.f32 %v1073_v14, %v1010_v48  ;;  %v975_v57 = vsel %vm961_vm5, %v944_v46, %v945_v12  ;;  %v1381_v48 = vmax.f32 %v1379_v25, %v1380_v39 }
 0x195   :  { %v1011_v16 = vadd.f32 %v975_v57, %v543_v45 }
 0x196   :  { %v1382_v18 = vmax.f32 %v1315_v15, %v1316_v21  ;;  %v1204_v19 = vadd.f32 %v1170_v8, %v1107_v28 }
 0x198   :  { %v772_v26 = vpop.f32.mrf.mxu2  ;;  %v885_v52 = vpop.f32.mrf.mxu3  ;;  %v1383_v29 = vrot.slane %v1382_v18, 4  ;;  %v1240_v42 = vadd.f32 %v2153_v31, %v1204_v19 }
 0x199   :  { %v1044_v30 = vrot.slane %v772_v26, 2  ;;  %v1141_v2 = vrot.slane %v885_v52, 3  ;;  %v549_v32 = vpop.f32.mrf.mxu0  ;;  %v662_v4 = vpop.f32.mrf.mxu1 }
 0x19a   :  { %v946_v35 = vrot.slane %v662_v4, 1  ;;  %v1384_v37 = vmax.f32 %v1382_v18, %v1383_v29  ;;  %v1272_v24 = vmax.f32 %v1240_v42, 0.0 }
 0x19b   :  { %v1072_v45 = vsel %vm1058_vm7, %v1043_v44, %v1044_v30  ;;  %v1169_v38 = vsel %vm1155_vm9, %v1140_v53, %v1141_v2  ;;  %v1488_v44 = vsel %vm1487_vm1, %v1367_v40, %v2323_v11 }
 0x19c   :  { %v1108_v7 = vadd.f32 %v1072_v45, %v1011_v16  ;;  %v974_v46 = vsel %vm961_vm5, %v945_v12, %v946_v35  ;;  %v1385_v47 = vrot.slane %v1384_v37, 2  ;;  %v1490_v0 = vsel %vm1489_vm2, %v1374_v20, %v1488_v44 }
 0x19d   :  { %v1012_v27 = vadd.f32 %v974_v46, %v546_v56  ;;  %v1317_v12 = vmul.f32 %v2171_v54, %v1272_v24  ;;  %v1492_v14 = vsel %vm1491_vm3, %v1381_v48, %v1490_v0 }
 0x19e   :  { %v1205_v1 = vadd.f32 %v1169_v38, %v1108_v7  ;;  %v1386_v22 = vmax.f32 %v1384_v37, %v1385_v47 }
 0x1a0   :  { %v1241_v3 = vadd.f32 %v2153_v31, %v1205_v1  ;;  %v775_v6 = vpop.f32.mrf.mxu2  ;;  %v888_v49 = vpop.f32.mrf.mxu3  ;;  %v1387_v33 = vrot.slane %v1386_v22, 1 }
 0x1a1   :  { %v1045_v50 = vrot.slane %v775_v6, 2  ;;  %v1142_v51 = vrot.slane %v888_v49, 3  ;;  %v552_v41 = vpop.f32.mrf.mxu0  ;;  %v665_v43 = vpop.f32.mrf.mxu1 }
 0x1a2   :  { %v1273_v53 = vmax.f32 %v1241_v3, 0.0  ;;  %v947_v56 = vrot.slane %v665_v43, 1  ;;  %v1388_v59 = vmax.f32 %v1386_v22, %v1387_v33 }
 0x1a3   :  { %v1071_v31 = vsel %vm1058_vm7, %v1044_v30, %v1045_v50  ;;  %v1168_v13 = vsel %vm1155_vm9, %v1141_v2, %v1142_v51  ;;  %v2504_v30 = vld [vmem:[#allocation7] ss:$0 sm:$0xff] }
 0x1a4   :  { %v1318_v8 = vmul.f32 %v2174_v55, %v1273_v53  ;;  %v1109_v10 = vadd.f32 %v1071_v31, %v1012_v27  ;;  %v973_v11 = vsel %vm961_vm5, %v946_v35, %v947_v56  ;;  %v1494_v15 = vsel %vm1493_vm6, %v1388_v59, %v1492_v14 }
 0x1a5   :  { %v1013_v21 = vadd.f32 %v973_v11, %v549_v32  ;;  %1520 = vmatmul.f32.vlgmr.msrb.gmra.mxu0 %v1494_v15 }
 0x1a6   :  { %v1389_v28 = vmax.f32 %v1317_v12, %v1318_v8  ;;  %v1206_v57 = vadd.f32 %v1168_v13, %v1109_v10 }
 0x1a8   :  { %v778_v60 = vpop.f32.mrf.mxu2  ;;  %v891_v16 = vpop.f32.mrf.mxu3  ;;  %v1242_v2 = vadd.f32 %v2504_v30, %v1206_v57  ;;  %v1390_v35 = vrot.slane %v1389_v28, 4 }
 0x1a9   :  { %v1046_v18 = vrot.slane %v778_v60, 2  ;;  %v1143_v19 = vrot.slane %v891_v16, 3  ;;  %v555_v23 = vpop.f32.mrf.mxu0  ;;  %v668_v25 = vpop.f32.mrf.mxu1 }
 0x1aa   :  { %v948_v26 = vrot.slane %v668_v25, 1  ;;  %v1274_v37 = vmax.f32 %v1242_v2, 0.0  ;;  %v1391_v27 = vmax.f32 %v1389_v28, %v1390_v35 }
 0x1ab   :  { %v1070_v52 = vsel %vm1058_vm7, %v1045_v50, %v1046_v18  ;;  %v1167_v29 = vsel %vm1155_vm9, %v1142_v51, %v1143_v19 }
 0x1ac   :  { %v1110_v32 = vadd.f32 %v1070_v52, %v1013_v21  ;;  %v972_v4 = vsel %vm961_vm5, %v947_v56, %v948_v26  ;;  %v1319_v24 = vmul.f32 %v2171_v54, %v1274_v37  ;;  %v1392_v33 = vrot.slane %v1391_v27, 2 }
 0x1ad   :  { %v1014_v34 = vadd.f32 %v972_v4, %v552_v41 }
 0x1ae   :  { %v1207_v36 = vadd.f32 %v1167_v29, %v1110_v32  ;;  %v1393_v12 = vmax.f32 %v1391_v27, %v1392_v33 }
 0x1b0   :  { %v1243_v42 = vadd.f32 %v2504_v30, %v1207_v36  ;;  %v781_v45 = vpop.f32.mrf.mxu2  ;;  %v894_v38 = vpop.f32.mrf.mxu3  ;;  %v1394_v57 = vrot.slane %v1393_v12, 1 }
 0x1b1   :  { %v1047_v39 = vrot.slane %v781_v45, 2  ;;  %v1144_v7 = vrot.slane %v894_v38, 3  ;;  %v558_v46 = vpop.f32.mrf.mxu0  ;;  %v671_v47 = vpop.f32.mrf.mxu1 }
 0x1b2   :  { %v1275_v40 = vmax.f32 %v1243_v42, 0.0  ;;  %v949_v1 = vrot.slane %v671_v47, 1  ;;  %v1395_v4 = vmax.f32 %v1393_v12, %v1394_v57 }
 0x1b3   :  { %v1069_v20 = vsel %vm1058_vm7, %v1046_v18, %v1047_v39  ;;  %v1166_v22 = vsel %vm1155_vm9, %v1143_v19, %v1144_v7 }
 0x1b4   :  { %v1320_v48 = vmul.f32 %v2174_v55, %v1275_v40  ;;  %v1111_v3 = vadd.f32 %v1069_v20, %v1014_v34  ;;  %v971_v6 = vsel %vm961_vm5, %v948_v26, %v949_v1 }
 0x1b5   :  { %v1015_v49 = vadd.f32 %v971_v6, %v555_v23 }
 0x1b6   :  { %v1396_v50 = vmax.f32 %v1319_v24, %v1320_v48  ;;  %v1208_v51 = vadd.f32 %v1166_v22, %v1111_v3 }
 0x1b8   :  { %v1397_v41 = vrot.slane %v1396_v50, 4  ;;  %v784_v43 = vpop.f32.mrf.mxu2  ;;  %v897_v44 = vpop.f32.mrf.mxu3  ;;  %v1244_v11 = vadd.f32 %v2504_v30, %v1208_v51 }
 0x1b9   :  { %v1048_v53 = vrot.slane %v784_v43, 2  ;;  %v1145_v56 = vrot.slane %v897_v44, 3  ;;  %v561_v59 = vpop.f32.mrf.mxu0  ;;  %v674_v0 = vpop.f32.mrf.mxu1 }
 0x1ba   :  { %v1398_v31 = vmax.f32 %v1396_v50, %v1397_v41  ;;  %v950_v13 = vrot.slane %v674_v0, 1  ;;  %v1276_v19 = vmax.f32 %v1244_v11, 0.0 }
 0x1bb   :  { %v1068_v14 = vsel %vm1058_vm7, %v1047_v39, %v1048_v53  ;;  %v1165_v8 = vsel %vm1155_vm9, %v1144_v7, %v1145_v56 }
 0x1bc   :  { %v1399_v10 = vrot.slane %v1398_v31, 2  ;;  %v1112_v15 = vadd.f32 %v1068_v14, %v1015_v49  ;;  %v970_v21 = vsel %vm961_vm5, %v949_v1, %v950_v13  ;;  %v1321_v42 = vmul.f32 %v2171_v54, %v1276_v19 }
 0x1bd   :  { %v1016_v28 = vadd.f32 %v970_v21, %v558_v46 }
 0x1be   :  { %v1400_v60 = vmax.f32 %v1398_v31, %v1399_v10  ;;  %v1209_v16 = vadd.f32 %v1165_v8, %v1112_v15 }
 0x1c0   :  { %v1401_v18 = vrot.slane %v1400_v60, 1  ;;  %v1245_v23 = vadd.f32 %v2504_v30, %v1209_v16  ;;  %v787_v25 = vpop.f32.mrf.mxu2  ;;  %v900_v26 = vpop.f32.mrf.mxu3 }
 0x1c1   :  { %v1049_v52 = vrot.slane %v787_v25, 2  ;;  %v1146_v29 = vrot.slane %v900_v26, 3  ;;  %v2526_v2 = vpop.f32.mrf.mxu0  ;;  %v2528_v32 = vpop.f32.mrf.mxu1 }
 0x1c2   :  { %v1402_v34 = vmax.f32 %v1400_v60, %v1401_v18  ;;  %v1277_v35 = vmax.f32 %v1245_v23, 0.0  ;;  %v951_v37 = vrot.slane %v2528_v32, 1 }
 0x1c3   :  { %v1067_v36 = vsel %vm1058_vm7, %v1048_v53, %v1049_v52  ;;  %v1164_v7 = vsel %vm1155_vm9, %v1145_v56, %v1146_v29 }
 0x1c4   :  { %v1322_v45 = vmul.f32 %v2174_v55, %v1277_v35  ;;  %v1113_v38 = vadd.f32 %v1067_v36, %v1016_v28  ;;  %v1495_v39 = vsel %vm1481_vm4, %v1402_v34, %v1395_v4  ;;  %v969_v27 = vsel %vm961_vm5, %v950_v13, %v951_v37 }
 0x1c5   :  { %v1017_v49 = vadd.f32 %v969_v27, %v561_v59 }
 0x1c6   :  { %v1403_v46 = vmax.f32 %v1321_v42, %v1322_v45  ;;  %v1210_v47 = vadd.f32 %v1164_v7, %v1113_v38 }
 0x1c8   :  { %v1404_v40 = vrot.slane %v1403_v46, 4  ;;  %v790_v1 = vpop.f32.mrf.mxu2  ;;  %v2540_v20 = vpop.f32.mrf.mxu3  ;;  %v1246_v51 = vadd.f32 %v2504_v30, %v1210_v47 }
 0x1c9   :  { %v1050_v22 = vrot.slane %v790_v1, 2  ;;  %v1147_v24 = vrot.slane %v2540_v20, 3  ;;  %v567_v48 = vpop.f32.mrf.mxu0  ;;  %v680_v3 = vpop.f32.mrf.mxu1 }
 0x1ca   :  { %v1405_v6 = vmax.f32 %v1403_v46, %v1404_v40  ;;  %v1278_v0 = vmax.f32 %v1246_v51, 0.0  ;;  %v952_v34 = vrot.slane %v680_v3, 1 }
 0x1cb   :  { %v1066_v33 = vsel %vm1058_vm7, %v1049_v52, %v1050_v22  ;;  %v1163_v43 = vsel %vm1155_vm9, %v1146_v29, %v1147_v24 }
 0x1cc   :  { %v1406_v50 = vrot.slane %v1405_v6, 2  ;;  %v1114_v41 = vadd.f32 %v1066_v33, %v1017_v49  ;;  %v1323_v11 = vmul.f32 %v2171_v54, %v1278_v0  ;;  %v968_v27 = vsel %vm961_vm5, %v951_v37, %v952_v34 }
 0x1cd   :  { %v1018_v33 = vadd.f32 %v968_v27, %v2526_v2 }
 0x1ce   :  { %v1407_v44 = vmax.f32 %v1405_v6, %v1406_v50  ;;  %v1211_v53 = vadd.f32 %v1163_v43, %v1114_v41 }
 0x1d0   :  { %v1408_v56 = vrot.slane %v1407_v44, 1  ;;  %v1247_v12 = vadd.f32 %v2504_v30, %v1211_v53  ;;  %v793_v31 = vpop.f32.mrf.mxu2  ;;  %v906_v59 = vpop.f32.mrf.mxu3 }
 0x1d1   :  { %v570_v13 = vpop.f32.mrf.mxu0  ;;  %v683_v14 = vpop.f32.mrf.mxu1  ;;  %v1051_v7 = vrot.slane %v793_v31, 2  ;;  %v1148_v0 = vrot.slane %v906_v59, 3 }
 0x1d2   :  { %v1409_v8 = vmax.f32 %v1407_v44, %v1408_v56  ;;  %v1279_v10 = vmax.f32 %v1247_v12, 0.0  ;;  %v953_v29 = vrot.slane %v683_v14, 1 }
 0x1d3   :  { %v1065_v50 = vsel %vm1058_vm7, %v1050_v22, %v1051_v7  ;;  %v1162_v59 = vsel %vm1155_vm9, %v1147_v24, %v1148_v0 }
 0x1d4   :  { %v1324_v15 = vmul.f32 %v2174_v55, %v1279_v10  ;;  %v1496_v21 = vsel %vm1483_vm10, %v1409_v8, %v1495_v39  ;;  %v967_v46 = vsel %vm961_vm5, %v952_v34, %v953_v29  ;;  %v1115_v14 = vadd.f32 %v1065_v50, %v1018_v33 }
 0x1d5   :  { %v1019_v3 = vadd.f32 %v967_v46, %v567_v48 }
 0x1d6   :  { %v1410_v28 = vmax.f32 %v1323_v11, %v1324_v15 }
 0x1d8   :  { %v1411_v57 = vrot.slane %v1410_v28, 4  ;;  %v796_v60 = vpop.f32.mrf.mxu2  ;;  %v909_v16 = vpop.f32.mrf.mxu3 }
 0x1d9   :  { %v573_v18 = vpop.f32.mrf.mxu0  ;;  %v686_v19 = vpop.f32.mrf.mxu1  ;;  %v1052_v36 = vrot.slane %v796_v60, 2  ;;  %v1149_v51 = vrot.slane %v909_v16, 3  ;;  %v1212_v60 = vadd.f32 %v1162_v59, %v1115_v14 }
 0x1da   :  { %v1412_v23 = vmax.f32 %v1410_v28, %v1411_v57  ;;  %v954_v45 = vrot.slane %v686_v19, 1 }
 0x1db   :  { %v1064_v1 = vsel %vm1058_vm7, %v1051_v7, %v1052_v36  ;;  %v1161_v22 = vsel %vm1155_vm9, %v1148_v0, %v1149_v51  ;;  %v1248_v24 = vadd.f32 %v2504_v30, %v1212_v60 }
 0x1dc   :  { %v1413_v25 = vrot.slane %v1412_v23, 2  ;;  %v966_v6 = vsel %vm961_vm5, %v953_v29, %v954_v45  ;;  %v1116_v37 = vadd.f32 %v1064_v1, %v1019_v3 }
 0x1dd   :  { %v1020_v12 = vadd.f32 %v966_v6, %v570_v13  ;;  %v1280_v7 = vmax.f32 %v1248_v24, 0.0 }
 0x1de   :  { %v1414_v26 = vmax.f32 %v1412_v23, %v1413_v25 }
 0x1e0   :  { %v1415_v52 = vrot.slane %v1414_v26, 1  ;;  %v799_v32 = vpop.f32.mrf.mxu2  ;;  %v912_v4 = vpop.f32.mrf.mxu3 }
 0x1e1   :  { %v689_v35 = vpop.f32.mrf.mxu1  ;;  %v576_v38 = vpop.f32.mrf.mxu0  ;;  %v1053_v40 = vrot.slane %v799_v32, 2  ;;  %v1150_v8 = vrot.slane %v912_v4, 3 }
 0x1e2   :  { %v1416_v42 = vmax.f32 %v1414_v26, %v1415_v52  ;;  %v955_v39 = vrot.slane %v689_v35, 1 }
 0x1e3   :  { %v1063_v44 = vsel %vm1058_vm7, %v1052_v36, %v1053_v40  ;;  %v1160_v16 = vsel %vm1155_vm9, %v1149_v51, %v1150_v8 }
 0x1e4   :  { %v2557_v47 = vsel %vm1485_vm13, %v1416_v42, %v1496_v21  ;;  %v965_v49 = vsel %vm961_vm5, %v954_v45, %v955_v39  ;;  %v1117_v11 = vadd.f32 %v1063_v44, %v1020_v12  ;;  %v1213_v21 = vadd.f32 %v1161_v22, %v1116_v37 }
 0x1e5   :  { %v1021_v31 = vadd.f32 %v965_v49, %v573_v18  ;;  %v1325_v37 = vmul.f32 %v2171_v54, %v1280_v7 }
 0x1e6   :  { %v1214_v19 = vadd.f32 %v1160_v16, %v1117_v11  ;;  %v1249_v26 = vadd.f32 %v2504_v30, %v1213_v21 }
 0x1e8   :  { %v802_v41 = vpop.f32.mrf.mxu2  ;;  %v915_v43 = vpop.f32.mrf.mxu3  ;;  %v1250_v36 = vadd.f32 %v2504_v30, %v1214_v19  ;;  %v1281_v45 = vmax.f32 %v1249_v26, 0.0 }
 0x1e9   :  { %v1054_v53 = vrot.slane %v802_v41, 2  ;;  %v1151_v48 = vrot.slane %v915_v43, 3  ;;  %v692_v56 = vpop.f32.mrf.mxu1  ;;  %v579_v57 = vpop.f32.mrf.mxu0 }
 0x1ea   :  { %v956_v10 = vrot.slane %v692_v56, 1  ;;  %v1326_v49 = vmul.f32 %v2174_v55, %v1281_v45 }
 0x1eb   :  { %v1062_v2 = vsel %vm1058_vm7, %v1053_v40, %v1054_v53  ;;  %v1159_v28 = vsel %vm1155_vm9, %v1150_v8, %v1151_v48  ;;  %v1282_v40 = vmax.f32 %v1250_v36, 0.0 }
 0x1ec   :  { %v1118_v15 = vadd.f32 %v1062_v2, %v1021_v31  ;;  %v964_v18 = vsel %vm961_vm5, %v955_v39, %v956_v10  ;;  %v1417_v12 = vmax.f32 %v1325_v37, %v1326_v49 }
 0x1ed   :  { %v1022_v32 = vadd.f32 %v964_v18, %v576_v38 }
 0x1ee   :  { %v1215_v13 = vadd.f32 %v1159_v28, %v1118_v15  ;;  %v1418_v28 = vrot.slane %v1417_v12, 4 }
 0x1f0   :  { %v805_v23 = vpop.f32.mrf.mxu2  ;;  %v918_v25 = vpop.f32.mrf.mxu3  ;;  %v1251_v20 = vadd.f32 %v2504_v30, %v1215_v13 }
 0x1f1   :  { %v1055_v52 = vrot.slane %v805_v23, 2  ;;  %v695_v29 = vpop.f32.mrf.mxu1  ;;  %v1152_v34 = vrot.slane %v918_v25, 3  ;;  %v582_v27 = vpop.f32.mrf.mxu0 }
 0x1f2   :  { %v957_v35 = vrot.slane %v695_v29, 1  ;;  %v1283_v39 = vmax.f32 %v1251_v20, 0.0  ;;  %v1419_v29 = vmax.f32 %v1417_v12, %v1418_v28 }
 0x1f3   :  { %v1061_v4 = vsel %vm1058_vm7, %v1054_v53, %v1055_v52  ;;  %v1158_v46 = vsel %vm1155_vm9, %v1151_v48, %v1152_v34  ;;  %v1327_v48 = vmul.f32 %v2171_v54, %v1282_v40 }
 0x1f4   :  { %v1119_v42 = vadd.f32 %v1061_v4, %v1022_v32  ;;  %v963_v38 = vsel %vm961_vm5, %v956_v10, %v957_v35  ;;  %v1328_v41 = vmul.f32 %v2174_v55, %v1283_v39 }
 0x1f5   :  { %v1023_v43 = vadd.f32 %v963_v38, %v579_v57 }
 0x1f6   :  { %v1216_v1 = vadd.f32 %v1158_v46, %v1119_v42  ;;  %v1424_v14 = vmax.f32 %v1327_v48, %v1328_v41  ;;  %v1420_v42 = vrot.slane %v1419_v29, 2 }
 0x1f8   :  { %v808_v3 = vpop.f32.mrf.mxu2  ;;  %v921_v6 = vpop.f32.mrf.mxu3  ;;  %v1252_v56 = vadd.f32 %v2504_v30, %v1216_v1  ;;  %v1425_v60 = vrot.slane %v1424_v14, 4 }
 0x1f9   :  { %v1056_v33 = vrot.slane %v808_v3, 2  ;;  %v1153_v50 = vrot.slane %v921_v6, 3  ;;  %v698_v51 = vpop.f32.mrf.mxu1  ;;  %v585_v57 = vpop.f32.mrf.mxu0 }
 0x1fa   :  { %v958_v53 = vrot.slane %v698_v51, 1  ;;  %v1284_v22 = vmax.f32 %v1252_v56, 0.0  ;;  %v1426_v24 = vmax.f32 %v1424_v14, %v1425_v60 }
 0x1fb   :  { %v1060_v44 = vsel %vm1058_vm7, %v1055_v52, %v1056_v33  ;;  %v1157_v31 = vsel %vm1155_vm9, %v1152_v34, %v1153_v50 }
 0x1fc   :  { %v1120_v0 = vadd.f32 %v1060_v44, %v1023_v43  ;;  %v962_v2 = vsel %vm961_vm5, %v957_v35, %v958_v53  ;;  %v993_v10 = vsel %vm961_vm5, %v958_v53, %v927_v5  ;;  %v1329_v5 = vmul.f32 %v2171_v54, %v1284_v22 }
 0x1fd   :  { %v1024_v18 = vadd.f32 %v962_v2, %v582_v27  ;;  %v1025_v19 = vadd.f32 %v993_v10, %v585_v57  ;;  %v1427_v7 = vrot.slane %v1426_v24, 2 }
 0x1fe   :  { %v1217_v8 = vadd.f32 %v1157_v31, %v1120_v0  ;;  %v1757_v0 = vld [vmem:[%s85_s27] ss:$0 sm:$0xff] }
 0x1ff   :  { %v1428_v40 = vmax.f32 %v1426_v24, %v1427_v7 }
 0x200   :  { %v1253_v11 = vadd.f32 %v2504_v30, %v1217_v8  ;;  %v811_v15 = vpop.f32.mrf.mxu2  ;;  %v924_v21 = vpop.f32.mrf.mxu3 }
 0x201   :  { %v1057_v59 = vrot.slane %v811_v15, 2  ;;  %v1154_v13 = vrot.slane %v924_v21, 3  ;;  %v1429_v49 = vrot.slane %v1428_v40, 1 }
 0x202   :  { %v1285_v16 = vmax.f32 %v1253_v11, 0.0 }
 0x203   :  { %v1059_v23 = vsel %vm1058_vm7, %v1056_v33, %v1057_v59  ;;  %v1090_v58 = vsel %vm1058_vm7, %v1057_v59, %v1026_v9  ;;  %v1156_v20 = vsel %vm1155_vm9, %v1153_v50, %v1154_v13  ;;  %v1187_v32 = vsel %vm1155_vm9, %v1154_v13, %v1123_v17 }
 0x204   :  { %v1330_v25 = vmul.f32 %v2174_v55, %v1285_v16  ;;  %v1121_v26 = vadd.f32 %v1059_v23, %v1024_v18  ;;  %v1122_v52 = vadd.f32 %v1090_v58, %v1025_v19  ;;  %v1421_v17 = vmax.f32 %v1419_v29, %v1420_v42 }
 0x205   :  { %v1430_v41 = vmax.f32 %v1428_v40, %v1429_v49 }
 0x206   :  { %v1431_v61 = vmax.f32 %v1329_v5, %v1330_v25  ;;  %v1218_v4 = vadd.f32 %v1156_v20, %v1121_v26  ;;  %v1219_v34 = vadd.f32 %v1187_v32, %v1122_v52  ;;  %v1422_v6 = vrot.slane %v1421_v17, 1 }
 0x208   :  { %v1432_v9 = vrot.slane %v1431_v61, 4  ;;  %v1254_v35 = vadd.f32 %v2504_v30, %v1218_v4  ;;  %v1255_v36 = vadd.f32 %v2504_v30, %v1219_v34  ;;  %v1423_v51 = vmax.f32 %v1421_v17, %v1422_v6 }
 0x20a   :  { %v1286_v45 = vmax.f32 %v1254_v35, 0.0  ;;  %v1287_v39 = vmax.f32 %v1255_v36, 0.0  ;;  %v1433_v46 = vmax.f32 %v1431_v61, %v1432_v9 }
 0x20c   :  { %v1331_v27 = vmul.f32 %v2171_v54, %v1286_v45  ;;  %v1332_v62 = vmul.f32 %v2174_v55, %v1287_v39  ;;  %v1434_v63 = vrot.slane %v1433_v46, 2  ;;  %v1498_v54 = vsel %vm1487_vm1, %v1423_v51, %v2557_v47 }
 0x20d   :  { %v1499_v53 = vsel %vm1489_vm2, %v1430_v41, %v1498_v54 }
 0x20e   :  { %v1438_v38 = vmax.f32 %v1331_v27, %v1332_v62  ;;  %v1435_v1 = vmax.f32 %v1433_v46, %v1434_v63 }
 0x210   :  { %v1439_v3 = vrot.slane %v1438_v38, 4  ;;  %v1436_v30 = vrot.slane %v1435_v1, 1 }
 0x212   :  { %v1440_v33 = vmax.f32 %v1438_v38, %v1439_v3  ;;  %v1437_v37 = vmax.f32 %v1435_v1, %v1436_v30 }
 0x214   :  { %v1441_v50 = vrot.slane %v1440_v33, 2  ;;  %v1500_v48 = vsel %vm1491_vm3, %v1437_v37, %v1499_v53 }
 0x216   :  { %v1442_v43 = vmax.f32 %v1440_v33, %v1441_v50 }
 0x218   :  { %v1443_v44 = vrot.slane %v1442_v43, 1 }
 0x21a   :  { %v1444_v55 = vmax.f32 %v1442_v43, %v1443_v44 }
 0x21c   :  { %v1501_v56 = vsel %vm1493_vm6, %v1444_v55, %v1500_v48 }
 0x21d   :  { %1523 = vmatmul.f32.vlgmr.msrb.gmra.mxu1 %v1501_v56 }
 0x222   :  { %v1521_v12 = vpop.f32.mrf.mxu0 }
 0x223   :  { %v1522_v31 = vadd.f32 %v1757_v0, %v1521_v12 }
 0x225   :  { %1527 = vst [vmem:[#allocation9] sm:$0xff] %v1522_v31 }
 0x29a   :  { %v1524_v47 = vpop.f32.mrf.mxu1 }
 0x29b   :  { %v1525_v14 = vadd.f32 %v1757_v0, %v1524_v47 }
 0x29d   :  { %1528 = vst [vmem:[#allocation9 + $0x8] sm:$0xff] %v1525_v14 }
 0x29e   :  { %1541 = dma.vmem_to_hbm [thread:$0]  %s1534_s7, 256, %s1536_s9, [#allocation6], %s1845_s3, %s1845_s3, %s1846_s10  }
 0x29f   :  { %1835 = dma.done.wait [#allocation6], 256  }
 0x2a0   :  { %1836 = vsyncadd [#allocation6], 4294967040 }
 0x2a1   :  { %1546 = vsyncpa [#allocation5], 1 }
 0x2a2   :  { %1547 = vsyncpa [#allocation8], 1 }
 0x2a3   :  { %1548 = vsyncpa [#allocation6], 1 }

</bundles_post_ra>
